<compile_context>
chip_gen: v6e
topology: v6e:2x2x1
jax: 0.10.0
libtpu: 0.0.40
codegen_flags: <defaults>
</compile_context>

<pallas_src>
import jax
import jax.numpy as jnp
from jax.experimental import pallas as pl
from jax.experimental.pallas import tpu as pltpu


def block_forward(x, conv_w, conv_b, gn_gamma, gn_beta, *, groups=8, eps=1e-5):
    """Fused Conv2d(3x3, pad=1) + GroupNorm + Mish.  x: (B, C_in, H, W) NCHW."""
    B, C_in, H, W = x.shape
    C_out = conv_w.shape[0]
    assert conv_w.shape == (C_out, C_in, 3, 3)
    assert C_out % groups == 0
    cg = C_out // groups

    # --- choose padded width: at least W+2 (conv halo); round up a little if
    # that makes H*Wp a multiple of 128 (fully lane-dense output stores).
    Wp = W + 2
    for cand in range(W + 2, W + 2 + 17):
        if (H * cand) % 128 == 0:
            Wp = cand
            break
    Hp = H + 3                      # 1 top halo row + 2 bottom rows of slack
    HWp = H * Wp                    # flattened spatial extent seen by kernel
    Lp = Hp * Wp                    # flattened padded input extent

    # --- layout plumbing (cheap, tiny tensors) -----------------------------
    f32 = jnp.float32
    xp = jnp.pad(x.astype(f32), ((0, 0), (0, 0), (1, 2), (1, Wp - W - 1)))
    x_flat = xp.reshape(B, C_in, Lp)

    # taps: w9[kh*3 + kw] = conv_w[:, :, kh, kw]  -> (9, C_out, C_in)
    w9 = jnp.transpose(conv_w.astype(f32), (2, 3, 0, 1)).reshape(9, C_out, C_in)
    b2 = conv_b.astype(f32).reshape(C_out, 1)
    g2 = gn_gamma.astype(f32).reshape(C_out, 1)
    bt2 = gn_beta.astype(f32).reshape(C_out, 1)

    # group-averaging matrix: gmat[i, j] = 1/(cg*H*W) if same group else 0
    gid = jnp.arange(C_out) // cg
    gmat = (gid[:, None] == gid[None, :]).astype(f32) / float(cg * H * W)

    # valid-column mask over the flattened (H, Wp) slab (1 = real pixel)
    col = jnp.arange(HWp) % Wp
    mask = (col < W).astype(f32).reshape(1, HWp)

    # --- fused kernel -------------------------------------------------------
    def kernel(x_ref, w_ref, b_ref, g_ref, bt_ref, gm_ref, m_ref, o_ref):
        # x_ref: (C_in, Lp)   w_ref: (9, C_out, C_in)   o_ref: (C_out, HWp)
        m = m_ref[...]                                   # (1, HWp)

        # 3x3 conv as 9 shifted-slab matmuls, accumulated in f32 on the MXU.
        acc = jnp.zeros((C_out, HWp), jnp.float32)
        for k in range(9):
            kh, kw = divmod(k, 3)
            off = kh * Wp + kw                           # static offset
            patch = x_ref[:, pl.ds(off, HWp)]            # (C_in, HWp)
            acc = acc + jnp.dot(w_ref[k], patch,
                                preferred_element_type=jnp.float32)
        acc = acc + b_ref[...]                           # conv bias

        # GroupNorm (masked over valid spatial columns), two-pass stats.
        gm = gm_ref[...]                                 # (C_out, C_out)
        ch_sum = jnp.sum(acc * m, axis=1, keepdims=True)             # (C_out,1)
        mean = jnp.dot(gm, ch_sum, preferred_element_type=jnp.float32)
        cent = (acc - mean) * m
        ch_var = jnp.sum(cent * cent, axis=1, keepdims=True)
        var = jnp.dot(gm, ch_var, preferred_element_type=jnp.float32)
        y = (acc - mean) * jax.lax.rsqrt(var + eps) * g_ref[...] + bt_ref[...]

        # Mish: y * tanh(softplus(y)), numerically stable softplus.
        sp = jnp.maximum(y, 0.0) + jnp.log(1.0 + jnp.exp(-jnp.abs(y)))
        o_ref[...] = (y * jnp.tanh(sp)).astype(o_ref.dtype)

    out_flat = pl.pallas_call(
        kernel,
        out_shape=jax.ShapeDtypeStruct((B, C_out, HWp), f32),
        grid=(B,),
        in_specs=[
            pl.BlockSpec((None, C_in, Lp), lambda b: (b, 0, 0)),    # x (per-batch)
            pl.BlockSpec((9, C_out, C_in), lambda b: (0, 0, 0)),    # conv taps
            pl.BlockSpec((C_out, 1), lambda b: (0, 0)),             # conv bias
            pl.BlockSpec((C_out, 1), lambda b: (0, 0)),             # gn gamma
            pl.BlockSpec((C_out, 1), lambda b: (0, 0)),             # gn beta
            pl.BlockSpec((C_out, C_out), lambda b: (0, 0)),         # group matrix
            pl.BlockSpec((1, HWp), lambda b: (0, 0)),               # valid mask
        ],
        out_specs=pl.BlockSpec((None, C_out, HWp), lambda b: (b, 0, 0)),
        compiler_params=pltpu.CompilerParams(
            dimension_semantics=("parallel",)),
    )(x_flat, w9, b2, g2, bt2, gmat, mask)

    # drop the padding columns, restore NCHW
    out = out_flat.reshape(B, C_out, H, Wp)[:, :, :, :W]
    return out.astype(x.dtype)


class Block:
    """JAX/Pallas port of `Block(nn.Module)`: Conv2d(3x3,p=1) -> GroupNorm -> Mish."""

    def __init__(self, dim, dim_out, groups=8, *, key):
        kw_, kb_, kg_, kbt = jax.random.split(key, 4)
        scale = 1.0 / float(dim * 9) ** 0.5
        self.conv_w = jax.random.normal(kw_, (dim_out, dim, 3, 3), jnp.float32) * scale
        self.conv_b = jax.random.normal(kb_, (dim_out,), jnp.float32) * scale
        self.gn_gamma = 1.0 + 0.1 * jax.random.normal(kg_, (dim_out,), jnp.float32)
        self.gn_beta = 0.1 * jax.random.normal(kbt, (dim_out,), jnp.float32)
        self.groups = groups

    def __call__(self, x):
        return block_forward(x, self.conv_w, self.conv_b,
                             self.gn_gamma, self.gn_beta, groups=self.groups)


def _reference_block(x, conv_w, conv_b, gamma, beta, groups=8, eps=1e-5):
    """Pure-JAX reference of Conv2d(3x3,p=1) -> GroupNorm -> Mish."""
    y = jax.lax.conv_general_dilated(
        x.astype(jnp.float32), conv_w.astype(jnp.float32),
        window_strides=(1, 1), padding=((1, 1), (1, 1)),
        dimension_numbers=("NCHW", "OIHW", "NCHW"))
    y = y + conv_b[None, :, None, None]
    B, C, H, W = y.shape
    cg = C // groups
    yg = y.reshape(B, groups, cg, H, W)
    mean = yg.mean(axis=(2, 3, 4), keepdims=True)
    var = ((yg - mean) ** 2).mean(axis=(2, 3, 4), keepdims=True)
    yn = ((yg - mean) / jnp.sqrt(var + eps)).reshape(B, C, H, W)
    yn = yn * gamma[None, :, None, None] + beta[None, :, None, None]
    sp = jnp.logaddexp(yn, 0.0)
    return (yn * jnp.tanh(sp)).astype(x.dtype)


if __name__ == "__main__":
    B, C_in, C_out, H, W = 2, 4, 32, 16, 16   # dim=4, dim_out=32, groups=8

    key = jax.random.PRNGKey(0)
    kx, kp = jax.random.split(key)
    x = jax.random.normal(kx, (B, C_in, H, W), dtype=jnp.float32)

    blk = Block(C_in, C_out, groups=8, key=kp)

    out = jax.block_until_ready(blk(x))

    ref = _reference_block(x, blk.conv_w, blk.conv_b, blk.gn_gamma,
                           blk.gn_beta, groups=8)
    assert out.shape == (B, C_out, H, W) and out.dtype == x.dtype
    max_err = float(jnp.max(jnp.abs(out - ref)))
    assert bool(jnp.allclose(out, ref, atol=1e-4, rtol=1e-4)), f"max|err|={max_err}"

    print("KERNEL_OK")
</pallas_src>

<mosaic_0001>
module attributes {stable_mosaic.version = 11 : i64} {
  func.func @kernel(%arg0: i32, %arg1: memref<1x4x456xf32, #tpu.memory_space<vmem>>, %arg2: memref<9x32x4xf32, #tpu.memory_space<vmem>>, %arg3: memref<32x1xf32, #tpu.memory_space<vmem>>, %arg4: memref<32x1xf32, #tpu.memory_space<vmem>>, %arg5: memref<32x1xf32, #tpu.memory_space<vmem>>, %arg6: memref<32x32xf32, #tpu.memory_space<vmem>>, %arg7: memref<1x384xf32, #tpu.memory_space<vmem>>, %arg8: memref<1x32x384xf32, #tpu.memory_space<vmem>>) attributes {dimension_semantics = [#tpu.dimension_semantics<parallel>], iteration_bounds = array<i64: 2>, scalar_prefetch = 0 : i64, scratch_operands = 0 : i64, tpu.core_type = #tpu.core_type<tc>, window_params = [{transform_indices = @transform_0, window_bounds = array<i64: 1, 4, 456>}, {pipeline_mode = #tpu.pipeline_mode<synchronous>, transform_indices = @transform_1, window_bounds = array<i64: 9, 32, 4>}, {pipeline_mode = #tpu.pipeline_mode<synchronous>, transform_indices = @transform_2, window_bounds = array<i64: 32, 1>}, {pipeline_mode = #tpu.pipeline_mode<synchronous>, transform_indices = @transform_3, window_bounds = array<i64: 32, 1>}, {pipeline_mode = #tpu.pipeline_mode<synchronous>, transform_indices = @transform_4, window_bounds = array<i64: 32, 1>}, {pipeline_mode = #tpu.pipeline_mode<synchronous>, transform_indices = @transform_5, window_bounds = array<i64: 32, 32>}, {pipeline_mode = #tpu.pipeline_mode<synchronous>, transform_indices = @transform_6, window_bounds = array<i64: 1, 384>}, {transform_indices = @transform_7, window_bounds = array<i64: 1, 32, 384>}]} {
    %c0 = arith.constant 0 : index
    %c0_0 = arith.constant 0 : index
    %0 = vector.load %arg7[%c0, %c0_0] : memref<1x384xf32, #tpu.memory_space<vmem>>, vector<1x384xf32>
    %cst = arith.constant 0.000000e+00 : f32
    %1 = vector.broadcast %cst : f32 to vector<32x384xf32>
    %c0_1 = arith.constant 0 : index
    %c0_2 = arith.constant 0 : index
    %c0_3 = arith.constant 0 : index
    %2 = vector.load %arg1[%c0_1, %c0_2, %c0_3] : memref<1x4x456xf32, #tpu.memory_space<vmem>>, vector<1x4x384xf32>
    %3 = vector.shape_cast %2 : vector<1x4x384xf32> to vector<4x384xf32>
    %c0_4 = arith.constant 0 : index
    %c0_5 = arith.constant 0 : index
    %c0_6 = arith.constant 0 : index
    %4 = vector.load %arg2[%c0_4, %c0_5, %c0_6] : memref<9x32x4xf32, #tpu.memory_space<vmem>>, vector<1x32x4xf32>
    %5 = vector.shape_cast %4 : vector<1x32x4xf32> to vector<32x4xf32>
    %cst_7 = arith.constant dense<0.000000e+00> : vector<32x384xf32>
    %6 = tpu.matmul %5, %3, %cst_7 {dimension_numbers = #tpu.dot_dimension_numbers<[1], [0], [0], [1], [0, 0, 1, 1], [], []>} : vector<32x4xf32>, vector<4x384xf32>, vector<32x384xf32> -> vector<32x384xf32>
    %7 = arith.addf %1, %6 : vector<32x384xf32>
    %c0_8 = arith.constant 0 : index
    %c0_9 = arith.constant 0 : index
    %c1 = arith.constant 1 : index
    %8 = vector.load %arg1[%c0_8, %c0_9, %c1] : memref<1x4x456xf32, #tpu.memory_space<vmem>>, vector<1x4x384xf32>
    %9 = vector.shape_cast %8 : vector<1x4x384xf32> to vector<4x384xf32>
    %c1_10 = arith.constant 1 : index
    %c0_11 = arith.constant 0 : index
    %c0_12 = arith.constant 0 : index
    %10 = vector.load %arg2[%c1_10, %c0_11, %c0_12] : memref<9x32x4xf32, #tpu.memory_space<vmem>>, vector<1x32x4xf32>
    %11 = vector.shape_cast %10 : vector<1x32x4xf32> to vector<32x4xf32>
    %cst_13 = arith.constant dense<0.000000e+00> : vector<32x384xf32>
    %12 = tpu.matmul %11, %9, %cst_13 {dimension_numbers = #tpu.dot_dimension_numbers<[1], [0], [0], [1], [0, 0, 1, 1], [], []>} : vector<32x4xf32>, vector<4x384xf32>, vector<32x384xf32> -> vector<32x384xf32>
    %13 = arith.addf %7, %12 : vector<32x384xf32>
    %c0_14 = arith.constant 0 : index
    %c0_15 = arith.constant 0 : index
    %c2 = arith.constant 2 : index
    %14 = vector.load %arg1[%c0_14, %c0_15, %c2] : memref<1x4x456xf32, #tpu.memory_space<vmem>>, vector<1x4x384xf32>
    %15 = vector.shape_cast %14 : vector<1x4x384xf32> to vector<4x384xf32>
    %c2_16 = arith.constant 2 : index
    %c0_17 = arith.constant 0 : index
    %c0_18 = arith.constant 0 : index
    %16 = vector.load %arg2[%c2_16, %c0_17, %c0_18] : memref<9x32x4xf32, #tpu.memory_space<vmem>>, vector<1x32x4xf32>
    %17 = vector.shape_cast %16 : vector<1x32x4xf32> to vector<32x4xf32>
    %cst_19 = arith.constant dense<0.000000e+00> : vector<32x384xf32>
    %18 = tpu.matmul %17, %15, %cst_19 {dimension_numbers = #tpu.dot_dimension_numbers<[1], [0], [0], [1], [0, 0, 1, 1], [], []>} : vector<32x4xf32>, vector<4x384xf32>, vector<32x384xf32> -> vector<32x384xf32>
    %19 = arith.addf %13, %18 : vector<32x384xf32>
    %c0_20 = arith.constant 0 : index
    %c0_21 = arith.constant 0 : index
    %c24 = arith.constant 24 : index
    %20 = vector.load %arg1[%c0_20, %c0_21, %c24] : memref<1x4x456xf32, #tpu.memory_space<vmem>>, vector<1x4x384xf32>
    %21 = vector.shape_cast %20 : vector<1x4x384xf32> to vector<4x384xf32>
    %c3 = arith.constant 3 : index
    %c0_22 = arith.constant 0 : index
    %c0_23 = arith.constant 0 : index
    %22 = vector.load %arg2[%c3, %c0_22, %c0_23] : memref<9x32x4xf32, #tpu.memory_space<vmem>>, vector<1x32x4xf32>
    %23 = vector.shape_cast %22 : vector<1x32x4xf32> to vector<32x4xf32>
    %cst_24 = arith.constant dense<0.000000e+00> : vector<32x384xf32>
    %24 = tpu.matmul %23, %21, %cst_24 {dimension_numbers = #tpu.dot_dimension_numbers<[1], [0], [0], [1], [0, 0, 1, 1], [], []>} : vector<32x4xf32>, vector<4x384xf32>, vector<32x384xf32> -> vector<32x384xf32>
    %25 = arith.addf %19, %24 : vector<32x384xf32>
    %c0_25 = arith.constant 0 : index
    %c0_26 = arith.constant 0 : index
    %c25 = arith.constant 25 : index
    %26 = vector.load %arg1[%c0_25, %c0_26, %c25] : memref<1x4x456xf32, #tpu.memory_space<vmem>>, vector<1x4x384xf32>
    %27 = vector.shape_cast %26 : vector<1x4x384xf32> to vector<4x384xf32>
    %c4 = arith.constant 4 : index
    %c0_27 = arith.constant 0 : index
    %c0_28 = arith.constant 0 : index
    %28 = vector.load %arg2[%c4, %c0_27, %c0_28] : memref<9x32x4xf32, #tpu.memory_space<vmem>>, vector<1x32x4xf32>
    %29 = vector.shape_cast %28 : vector<1x32x4xf32> to vector<32x4xf32>
    %cst_29 = arith.constant dense<0.000000e+00> : vector<32x384xf32>
    %30 = tpu.matmul %29, %27, %cst_29 {dimension_numbers = #tpu.dot_dimension_numbers<[1], [0], [0], [1], [0, 0, 1, 1], [], []>} : vector<32x4xf32>, vector<4x384xf32>, vector<32x384xf32> -> vector<32x384xf32>
    %31 = arith.addf %25, %30 : vector<32x384xf32>
    %c0_30 = arith.constant 0 : index
    %c0_31 = arith.constant 0 : index
    %c26 = arith.constant 26 : index
    %32 = vector.load %arg1[%c0_30, %c0_31, %c26] : memref<1x4x456xf32, #tpu.memory_space<vmem>>, vector<1x4x384xf32>
    %33 = vector.shape_cast %32 : vector<1x4x384xf32> to vector<4x384xf32>
    %c5 = arith.constant 5 : index
    %c0_32 = arith.constant 0 : index
    %c0_33 = arith.constant 0 : index
    %34 = vector.load %arg2[%c5, %c0_32, %c0_33] : memref<9x32x4xf32, #tpu.memory_space<vmem>>, vector<1x32x4xf32>
    %35 = vector.shape_cast %34 : vector<1x32x4xf32> to vector<32x4xf32>
    %cst_34 = arith.constant dense<0.000000e+00> : vector<32x384xf32>
    %36 = tpu.matmul %35, %33, %cst_34 {dimension_numbers = #tpu.dot_dimension_numbers<[1], [0], [0], [1], [0, 0, 1, 1], [], []>} : vector<32x4xf32>, vector<4x384xf32>, vector<32x384xf32> -> vector<32x384xf32>
    %37 = arith.addf %31, %36 : vector<32x384xf32>
    %c0_35 = arith.constant 0 : index
    %c0_36 = arith.constant 0 : index
    %c48 = arith.constant 48 : index
    %38 = vector.load %arg1[%c0_35, %c0_36, %c48] : memref<1x4x456xf32, #tpu.memory_space<vmem>>, vector<1x4x384xf32>
    %39 = vector.shape_cast %38 : vector<1x4x384xf32> to vector<4x384xf32>
    %c6 = arith.constant 6 : index
    %c0_37 = arith.constant 0 : index
    %c0_38 = arith.constant 0 : index
    %40 = vector.load %arg2[%c6, %c0_37, %c0_38] : memref<9x32x4xf32, #tpu.memory_space<vmem>>, vector<1x32x4xf32>
    %41 = vector.shape_cast %40 : vector<1x32x4xf32> to vector<32x4xf32>
    %cst_39 = arith.constant dense<0.000000e+00> : vector<32x384xf32>
    %42 = tpu.matmul %41, %39, %cst_39 {dimension_numbers = #tpu.dot_dimension_numbers<[1], [0], [0], [1], [0, 0, 1, 1], [], []>} : vector<32x4xf32>, vector<4x384xf32>, vector<32x384xf32> -> vector<32x384xf32>
    %43 = arith.addf %37, %42 : vector<32x384xf32>
    %c0_40 = arith.constant 0 : index
    %c0_41 = arith.constant 0 : index
    %c49 = arith.constant 49 : index
    %44 = vector.load %arg1[%c0_40, %c0_41, %c49] : memref<1x4x456xf32, #tpu.memory_space<vmem>>, vector<1x4x384xf32>
    %45 = vector.shape_cast %44 : vector<1x4x384xf32> to vector<4x384xf32>
    %c7 = arith.constant 7 : index
    %c0_42 = arith.constant 0 : index
    %c0_43 = arith.constant 0 : index
    %46 = vector.load %arg2[%c7, %c0_42, %c0_43] : memref<9x32x4xf32, #tpu.memory_space<vmem>>, vector<1x32x4xf32>
    %47 = vector.shape_cast %46 : vector<1x32x4xf32> to vector<32x4xf32>
    %cst_44 = arith.constant dense<0.000000e+00> : vector<32x384xf32>
    %48 = tpu.matmul %47, %45, %cst_44 {dimension_numbers = #tpu.dot_dimension_numbers<[1], [0], [0], [1], [0, 0, 1, 1], [], []>} : vector<32x4xf32>, vector<4x384xf32>, vector<32x384xf32> -> vector<32x384xf32>
    %49 = arith.addf %43, %48 : vector<32x384xf32>
    %c0_45 = arith.constant 0 : index
    %c0_46 = arith.constant 0 : index
    %c50 = arith.constant 50 : index
    %50 = vector.load %arg1[%c0_45, %c0_46, %c50] : memref<1x4x456xf32, #tpu.memory_space<vmem>>, vector<1x4x384xf32>
    %51 = vector.shape_cast %50 : vector<1x4x384xf32> to vector<4x384xf32>
    %c8 = arith.constant 8 : index
    %c0_47 = arith.constant 0 : index
    %c0_48 = arith.constant 0 : index
    %52 = vector.load %arg2[%c8, %c0_47, %c0_48] : memref<9x32x4xf32, #tpu.memory_space<vmem>>, vector<1x32x4xf32>
    %53 = vector.shape_cast %52 : vector<1x32x4xf32> to vector<32x4xf32>
    %cst_49 = arith.constant dense<0.000000e+00> : vector<32x384xf32>
    %54 = tpu.matmul %53, %51, %cst_49 {dimension_numbers = #tpu.dot_dimension_numbers<[1], [0], [0], [1], [0, 0, 1, 1], [], []>} : vector<32x4xf32>, vector<4x384xf32>, vector<32x384xf32> -> vector<32x384xf32>
    %55 = arith.addf %49, %54 : vector<32x384xf32>
    %c0_50 = arith.constant 0 : index
    %c0_51 = arith.constant 0 : index
    %56 = vector.load %arg3[%c0_50, %c0_51] : memref<32x1xf32, #tpu.memory_space<vmem>>, vector<32x1xf32>
    %57 = vector.broadcast %56 : vector<32x1xf32> to vector<32x384xf32>
    %58 = arith.addf %55, %57 : vector<32x384xf32>
    %c0_52 = arith.constant 0 : index
    %c0_53 = arith.constant 0 : index
    %59 = vector.load %arg6[%c0_52, %c0_53] : memref<32x32xf32, #tpu.memory_space<vmem>>, vector<32x32xf32>
    %60 = vector.broadcast %0 : vector<1x384xf32> to vector<32x384xf32>
    %61 = arith.mulf %58, %60 : vector<32x384xf32>
    %cst_54 = arith.constant dense<0.000000e+00> : vector<32xf32>
    %62 = vector.multi_reduction <add>, %61, %cst_54 [1] : vector<32x384xf32> to vector<32xf32>
    %63 = vector.shape_cast %62 : vector<32xf32> to vector<32x1xf32>
    %cst_55 = arith.constant dense<0.000000e+00> : vector<32x1xf32>
    %64 = tpu.matmul %59, %63, %cst_55 {dimension_numbers = #tpu.dot_dimension_numbers<[1], [0], [0], [1], [0, 0, 1, 1], [], []>} : vector<32x32xf32>, vector<32x1xf32>, vector<32x1xf32> -> vector<32x1xf32>
    %65 = vector.broadcast %64 : vector<32x1xf32> to vector<32x384xf32>
    %66 = arith.subf %58, %65 : vector<32x384xf32>
    %67 = vector.broadcast %0 : vector<1x384xf32> to vector<32x384xf32>
    %68 = arith.mulf %66, %67 : vector<32x384xf32>
    %69 = arith.mulf %68, %68 : vector<32x384xf32>
    %cst_56 = arith.constant dense<0.000000e+00> : vector<32xf32>
    %70 = vector.multi_reduction <add>, %69, %cst_56 [1] : vector<32x384xf32> to vector<32xf32>
    %71 = vector.shape_cast %70 : vector<32xf32> to vector<32x1xf32>
    %cst_57 = arith.constant dense<0.000000e+00> : vector<32x1xf32>
    %72 = tpu.matmul %59, %71, %cst_57 {dimension_numbers = #tpu.dot_dimension_numbers<[1], [0], [0], [1], [0, 0, 1, 1], [], []>} : vector<32x32xf32>, vector<32x1xf32>, vector<32x1xf32> -> vector<32x1xf32>
    %73 = vector.broadcast %64 : vector<32x1xf32> to vector<32x384xf32>
    %74 = arith.subf %58, %73 : vector<32x384xf32>
    %cst_58 = arith.constant 9.99999974E-6 : f32
    %75 = vector.broadcast %cst_58 : f32 to vector<32x1xf32>
    %76 = arith.addf %72, %75 : vector<32x1xf32>
    %77 = math.rsqrt %76 : vector<32x1xf32>
    %78 = vector.broadcast %77 : vector<32x1xf32> to vector<32x384xf32>
    %79 = arith.mulf %74, %78 : vector<32x384xf32>
    %c0_59 = arith.constant 0 : index
    %c0_60 = arith.constant 0 : index
    %80 = vector.load %arg4[%c0_59, %c0_60] : memref<32x1xf32, #tpu.memory_space<vmem>>, vector<32x1xf32>
    %81 = vector.broadcast %80 : vector<32x1xf32> to vector<32x384xf32>
    %82 = arith.mulf %79, %81 : vector<32x384xf32>
    %c0_61 = arith.constant 0 : index
    %c0_62 = arith.constant 0 : index
    %83 = vector.load %arg5[%c0_61, %c0_62] : memref<32x1xf32, #tpu.memory_space<vmem>>, vector<32x1xf32>
    %84 = vector.broadcast %83 : vector<32x1xf32> to vector<32x384xf32>
    %85 = arith.addf %82, %84 : vector<32x384xf32>
    %cst_63 = arith.constant 0.000000e+00 : f32
    %86 = vector.broadcast %cst_63 : f32 to vector<32x384xf32>
    %87 = arith.maximumf %85, %86 : vector<32x384xf32>
    %88 = math.absf %85 : vector<32x384xf32>
    %cst_64 = arith.constant 0.000000e+00 : f32
    %89 = vector.broadcast %cst_64 : f32 to vector<32x384xf32>
    %90 = arith.subf %89, %88 : vector<32x384xf32>
    %91 = math.exp %90 : vector<32x384xf32>
    %cst_65 = arith.constant 1.000000e+00 : f32
    %92 = vector.broadcast %cst_65 : f32 to vector<32x384xf32>
    %93 = arith.addf %92, %91 : vector<32x384xf32>
    %94 = math.log %93 : vector<32x384xf32>
    %95 = arith.addf %87, %94 : vector<32x384xf32>
    %96 = math.tanh %95 : vector<32x384xf32>
    %97 = arith.mulf %85, %96 : vector<32x384xf32>
    %c0_66 = arith.constant 0 : index
    %c0_67 = arith.constant 0 : index
    %c0_68 = arith.constant 0 : index
    %98 = vector.load %arg8[%c0_66, %c0_67, %c0_68] : memref<1x32x384xf32, #tpu.memory_space<vmem>>, vector<1x32x384xf32>
    %99 = vector.shape_cast %98 : vector<1x32x384xf32> to vector<32x384xf32>
    %100 = vector.shape_cast %97 : vector<32x384xf32> to vector<1x32x384xf32>
    tpu.vector_store %arg8[%c0_66, %c0_67, %c0_68], %100 {strides = array<i32>} : memref<1x32x384xf32, #tpu.memory_space<vmem>>, vector<1x32x384xf32>,
    return
  }
  func.func @transform_0(%arg0: i32) -> (i32, i32, i32) {
    %c0_i32 = arith.constant 0 : i32
    %c0_i32_0 = arith.constant 0 : i32
    %c0_i32_1 = arith.constant 0 : i32
    return %arg0, %c0_i32, %c0_i32_0 : i32, i32, i32
  }
  func.func @transform_1(%arg0: i32) -> (i32, i32, i32) {
    %c0_i32 = arith.constant 0 : i32
    %c0_i32_0 = arith.constant 0 : i32
    %c0_i32_1 = arith.constant 0 : i32
    %c0_i32_2 = arith.constant 0 : i32
    return %c0_i32, %c0_i32_0, %c0_i32_1 : i32, i32, i32
  }
  func.func @transform_2(%arg0: i32) -> (i32, i32) {
    %c0_i32 = arith.constant 0 : i32
    %c0_i32_0 = arith.constant 0 : i32
    %c0_i32_1 = arith.constant 0 : i32
    return %c0_i32, %c0_i32_0 : i32, i32
  }
  func.func @transform_3(%arg0: i32) -> (i32, i32) {
    %c0_i32 = arith.constant 0 : i32
    %c0_i32_0 = arith.constant 0 : i32
    %c0_i32_1 = arith.constant 0 : i32
    return %c0_i32, %c0_i32_0 : i32, i32
  }
  func.func @transform_4(%arg0: i32) -> (i32, i32) {
    %c0_i32 = arith.constant 0 : i32
    %c0_i32_0 = arith.constant 0 : i32
    %c0_i32_1 = arith.constant 0 : i32
    return %c0_i32, %c0_i32_0 : i32, i32
  }
  func.func @transform_5(%arg0: i32) -> (i32, i32) {
    %c0_i32 = arith.constant 0 : i32
    %c0_i32_0 = arith.constant 0 : i32
    %c0_i32_1 = arith.constant 0 : i32
    return %c0_i32, %c0_i32_0 : i32, i32
  }
  func.func @transform_6(%arg0: i32) -> (i32, i32) {
    %c0_i32 = arith.constant 0 : i32
    %c0_i32_0 = arith.constant 0 : i32
    %c0_i32_1 = arith.constant 0 : i32
    return %c0_i32, %c0_i32_0 : i32, i32
  }
  func.func @transform_7(%arg0: i32) -> (i32, i32, i32) {
    %c0_i32 = arith.constant 0 : i32
    %c0_i32_0 = arith.constant 0 : i32
    %c0_i32_1 = arith.constant 0 : i32
    return %arg0, %c0_i32, %c0_i32_0 : i32, i32, i32
  }
}

</mosaic_0001>

<bundles_post_ra>
// kernel: tpu_custom_call.1
= control target key start
LH: loop header
LB: loop body
LE: loop exit
PB: predicated region body
PF: predicated region fallthrough
CT: control target
= control target key end

     0   :  { %12 = vsyncpa [#allocation3], 0  ;;  %s4423_s0 = inlined_call_operand.vmem [shape: f32[2,4,456], index: 0, kind: input, shape index: {}]   ;;  %s4424_s1 = inlined_call_operand.vmem [shape: f32[9,32,4], index: 1, kind: input, shape index: {}]   ;;  %s4425_s2 = inlined_call_operand.vmem [shape: f32[32,1], index: 2, kind: input, shape index: {}]   ;;  %s4426_s3 = inlined_call_operand.vmem [shape: f32[32,1], index: 3, kind: input, shape index: {}]   ;;  %s4427_s4 = inlined_call_operand.vmem [shape: f32[32,1], index: 4, kind: input, shape index: {}]   ;;  %s4428_s5 = inlined_call_operand.vmem [shape: f32[32,32], index: 5, kind: input, shape index: {}]   ;;  %s4429_s6 = inlined_call_operand.vmem [shape: f32[1,384], index: 6, kind: input, shape index: {}]   ;;  %s4430_s7 = inlined_call_operand.hbm [shape: f32[2,32,384], index: 7, kind: output, shape index: {}]  }
   0x1   :  { %14 = vsyncpa [#allocation3 + $0x1], 0  ;;  %s3513_s24 = smov 0   ;;  %s3515_s25 = smov 0  }
   0x2   :  { %s3517_s26 = smov 0   ;;  %s3519_s27 = smov 0  }
   0x3 LB: > { %s3534_s28 = sadd.s32 4294967295, %s3458_s27   ;;  %s2949_s29 = sadd.s32 4294967294, %s3458_s27   ;;  %s3458_s27 = sphi %s3519_s27, %s4466_s27   ;;  %s3454_s26 = sphi %s3517_s26, %s4465_s26   ;;  %s3450_s25 = sphi %s3515_s25, %s4464_s25   ;;  %s3446_s24 = sphi %s3513_s24, %s4463_s24  }
   0x4   : > { %s3538_s30 = sadd.s32 1, %s3458_s27   ;;  %s179_s8 = sadd.s32 1, %s3454_s26 }
   0x5   : > { %s176_s9 = ssub.s32 %s3458_s27, %s3538_s30  ;;  %p189_p0 = scmp.ne.s32.totalorder %s3454_s26, %s3450_s25 }
   0x6   : > { %p177_p1 = scmp.eq.s32.totalorder %s176_s9, 0  ;;  %p190_p2 = scmp.eq.s32.totalorder %s3534_s28, 1 }
   0x7   : > { %p195_p3 = scmp.ne.s32.totalorder %s3450_s25, %s3446_s24  ;;  %p196_p4 = scmp.eq.s32.totalorder %s2949_s29, 1 }
   0x8   : > { %s3549_s10 = scalar_select %p177_p1, %s3454_s26, %s179_s8  }
   0x9   : > { %p3551_p5 = por %p190_p2, %p189_p0  ;;  %p3555_p6 = por %p196_p4, %p195_p3 }
   0xa   : > { %p2952_p7 = scmp.ge.s32.totalorder %s3458_s27, 1  ;;  %p240_p8 = scmp.lt.s32.totalorder %s3458_s27, 3 }
   0xc   : > { %p241_p9 = pnand %p2952_p7, %p240_p8 }
   0xe   : > { %244 = sbr.rel (%p241_p9) target bundleno = 1520 (0x5f0), region = 48 }
  0x13   : > { %p272_p10 = scmp.lt.s32.totalorder %s3534_s28, 1  ;;  %v3460_v0 = vmov 0.0   ;;  %s3461_s18 = smov 127   ;;  %v2285_v5 = vld [vmem:[%s4425_s2 + $0x18] sm:$0xff]  ;;  %v2284_v6 = vld [vmem:[%s4425_s2 + $0x10] sm:$0xff]  ;;  %v3469_v7 = vmov 0  }
  0x14   : > { %390 = vmatprep.mubr.f32.mxu0 %v3460_v0  ;;  %408 = vmatprep.mubr.f32.mxu1 %v3460_v0  ;;  %s3462_s19 = smov 126   ;;  %s3463_s20 = smov 104   ;;  %v2282_v8 = vld [vmem:[%s4425_s2] sm:$0xff]  ;;  %v2283_v9 = vld [vmem:[%s4425_s2 + $0x8] sm:$0xff]  ;;  %vm302_vm0 = vcmask 1039360   ;;  %vm319_vm1 = vcmask 1043456  }
  0x15   : > { %s273_s13 = scalar_select %p272_p10, %s3534_s28, 1  ;;  %3314 = vset.pattern.permute.xlu0 %v3469_v7  ;;  %3315 = vset.pattern.permute.xlu1 %v3469_v7  ;;  %v2955_v15 = vld [vmem:[%s4424_s1 + $0x20] sm:$0xff]  ;;  %vm306_vm2 = vcmask 31744   ;;  %v2958_v16 = vld [vmem:[%s4424_s1 + $0x38] sm:$0xff]  ;;  %v2956_v22 = vld [vmem:[%s4424_s1 + $0x28] sm:$0xff]  ;;  %vm712_vm3 = vcmask 1031168  }
  0x16   : > { %s3464_s21 = smov 103   ;;  %s3465_s22 = smov 102   ;;  %v2957_v23 = vld [vmem:[%s4424_s1 + $0x30] sm:$0xff]  ;;  %v280_v28 = vld [vmem:[%s4424_s1] sm:$0xff]  ;;  %v281_v31 = vld [vmem:[%s4424_s1 + $0x8] sm:$0xff]  ;;  %vm939_vm4 = vcmask 850944  }
  0x17   : > { %s3097_s14 = sshll.u32 %s273_s13, 4  ;;  %s3466_s23 = smov 80   ;;  %v282_v32 = vld [vmem:[%s4424_s1 + $0x10] sm:$0xff]  ;;  %v283_v37 = vld [vmem:[%s4424_s1 + $0x18] sm:$0xff]  ;;  %v2981_v39 = vld [vmem:[%s4424_s1 + $0x40] sm:$0xff]  ;;  %vm1166_vm5 = vcmask 842752  }
  0x18   : > { %s3568_s17 = scalar_lea.vmem %s4423_s0, %s3097_s14  ;;  %s3467_s29 = smov 79   ;;  %v2982_v43 = vld [vmem:[%s4424_s1 + $0x48] sm:$0xff]  ;;  %v2983_v45 = vld [vmem:[%s4424_s1 + $0x50] sm:$0xff]  ;;  %v2984_v50 = vld [vmem:[%s4424_s1 + $0x58] sm:$0xff]  ;;  %vm1393_vm6 = vcmask 834560   ;;  %vm1620_vm7 = vcmask 654336  }
  0x19   : > { %v3571_v1 = vld [vmem:[%s3568_s17] sm:$0xff]  ;;  %v284_v2 = vld [vmem:[%s3568_s17 + $0x8] sm:$0xff]  ;;  %s3468_s8 = smov 78   ;;  %v2998_v55 = vld [vmem:[%s4424_s1 + $0x70] sm:$0xff]  ;;  %vm1847_vm8 = vcmask 646144   ;;  %vm2074_vm9 = vcmask 637952  }
  0x1a   : > { %294 = vrot.lane.b32.xlu1 %v3571_v1, %s3461_s18  ;;  %v3577_v3 = vcombine.high %v3571_v1, %v3571_v1  ;;  %v293_v4 = vcombine.high %v284_v2, %v284_v2  ;;  %v279_v20 = vld [vmem:[%s3568_s17 + $0x8] sm:$0xf]  ;;  %v2996_v52 = vld [vmem:[%s4424_s1 + $0x60] sm:$0xff]  ;;  %v2999_v60 = vld [vmem:[%s4424_s1 + $0x78] sm:$0xff]  ;;  %vm2366_vm10 = vcmask 261120   ;;  %s3470_s15 = smov [#allocation2]  }
  0x1b   : > { %v2997_v53 = vld [vmem:[%s4424_s1 + $0x68] sm:$0xff]  ;;  %v3011_v61 = vld [vmem:[%s4424_s1 + $0x80] sm:$0xff]  ;;  %s3402_s16 = sshll.u32 %s3470_s15, 4  ;;  %s3403_s16 = int_to_ptr.vmem [resolvable:$false] %s3402_s16 }
  0x1c   : > { %296 = vrot.lane.b32.xlu0 %v3577_v3, %s3461_s18 }
  0x1e   : > { %300 = vrot.lane.b32.xlu1 %v293_v4, %s3461_s18 }
  0x20   : > { %298 = vrot.lane.b32.xlu0 %v284_v2, %s3461_s18  ;;  %s3404_s18 = scalar_lea.vmem %s3403_s16, 3072 }
  0x22   : > { %708 = vrot.lane.b32.xlu1 %v284_v2, %s3462_s19 }
  0x24   : > { %706 = vrot.lane.b32.xlu0 %v3577_v3, %s3462_s19 }
  0x26   : > { %710 = vrot.lane.b32.xlu1 %v293_v4, %s3462_s19 }
  0x28   : > { %704 = vrot.lane.b32.xlu0 %v3571_v1, %s3462_s19 }
  0x2a   : > { %937 = vrot.lane.b32.xlu1 %v293_v4, %s3463_s20 }
  0x2c   : > { %935 = vrot.lane.b32.xlu0 %v284_v2, %s3463_s20 }
  0x2e   : > { %931 = vrot.lane.b32.xlu1 %v3571_v1, %s3463_s20 }
  0x30   : > { %933 = vrot.lane.b32.xlu0 %v3577_v3, %s3463_s20 }
  0x32   : > { %1162 = vrot.lane.b32.xlu1 %v284_v2, %s3464_s21 }
  0x34   : > { %1160 = vrot.lane.b32.xlu0 %v3577_v3, %s3464_s21 }
  0x36   : > { %1164 = vrot.lane.b32.xlu1 %v293_v4, %s3464_s21 }
  0x38   : > { %1158 = vrot.lane.b32.xlu0 %v3571_v1, %s3464_s21  ;;  %s269_s21 = sand.u32 1, %s3450_s25  }
  0x3a   : > { %1391 = vrot.lane.b32.xlu1 %v293_v4, %s3465_s22 }
  0x3c   : > { %1389 = vrot.lane.b32.xlu0 %v284_v2, %s3465_s22 }
  0x3e   : > { %1385 = vrot.lane.b32.xlu1 %v3571_v1, %s3465_s22 }
  0x40   : > { %1387 = vrot.lane.b32.xlu0 %v3577_v3, %s3465_s22  ;;  %s3261_s22 = smul.u32 96, %s269_s21 }
  0x42   : > { %1616 = vrot.lane.b32.xlu1 %v284_v2, %s3466_s23 }
  0x44   : > { %1614 = vrot.lane.b32.xlu0 %v3577_v3, %s3466_s23 }
  0x46   : > { %1618 = vrot.lane.b32.xlu1 %v293_v4, %s3466_s23 }
  0x48   : > { %1612 = vrot.lane.b32.xlu0 %v3571_v1, %s3466_s23  ;;  %s4347_s23 = scalar_lea.vmem [#allocation2], %s3261_s22 }
  0x4a   : > { %1845 = vrot.lane.b32.xlu1 %v293_v4, %s3467_s29 }
  0x4c   : > { %1843 = vrot.lane.b32.xlu0 %v284_v2, %s3467_s29 }
  0x4e   : > { %1839 = vrot.lane.b32.xlu1 %v3571_v1, %s3467_s29 }
  0x50   : > { %1841 = vrot.lane.b32.xlu0 %v3577_v3, %s3467_s29  ;;  %s3262_s29 = smul.u32 1536, %s3534_s28  ;;  %s4383_s28 = scalar_lea.sflag [#allocation3], %s269_s21 }
  0x52   : > { %2070 = vrot.lane.b32.xlu1 %v284_v2, %s3468_s8  ;;  %v3012_v2 = vld [vmem:[%s4424_s1 + $0x88] sm:$0xff]  ;;  %s4375_s14 = scalar_lea.hbm %s4430_s7, %s3262_s29 }
  0x54   : > { %2068 = vrot.lane.b32.xlu0 %v3577_v3, %s3468_s8 }
  0x56   : > { %2072 = vrot.lane.b32.xlu1 %v293_v4, %s3468_s8  ;;  %v3013_v4 = vld [vmem:[%s4424_s1 + $0x90] sm:$0xff] }
  0x58   : > { %2066 = vrot.lane.b32.xlu0 %v3571_v1, %s3468_s8  ;;  %s2887_s8 = sshll.u32 %s4347_s23, 4  ;;  %s4377_s8 = int_to_ptr.vmem [resolvable:$true] %s2887_s8 }
  0x59   : > { %s3398_s17 = scalar_lea.vmem %s4377_s8, 1536  ;;  %p3405_p0 = scmp.lt.s32.totalorder %s4377_s8, %s3403_s16 }
  0x5a   : > { %2298 = vperm.xlu1 %3315, %v2284_v6   ;;  %p3399_p11 = scmp.ne.s32.totalorder %s4377_s8, %s3398_s17  ;;  %p3406_p1 = scmp.lt.s32.totalorder %s3404_s18, %s3398_s17 }
  0x5c   : > { %2303 = vperm.xlu0 %3314, %v2285_v5   ;;  %p3400_p12 = pnand %p3399_p11, %p3551_p5  ;;  %p3407_p2 = por %p3406_p1, %p3405_p0 }
  0x5e   : > { %2293 = vperm.xlu1 %3315, %v2283_v9   ;;  %v3014_v9 = vld [vmem:[%s4424_s1 + $0x98] sm:$0xff]  ;;  %p3401_p13 = pneg %p3400_p12 }
  0x60   : > { %2288 = vperm.xlu0 %3314, %v2282_v8   ;;  %p3408_p3 = pnand %p3407_p2, %p3401_p13 }
  0x8c   : > { %v295_v10 = vpop.permute.xlu1 %294 }
  0x8e   : > { %v297_v11 = vpop.permute.xlu0 %296 }
  0x8f   : > { %v303_v17 = vsel %vm302_vm0, %v295_v10, %v297_v11 }
  0x90   : > { %v301_v12 = vpop.permute.xlu1 %300 }
  0x92   : > { %v299_v13 = vpop.permute.xlu0 %298 }
  0x93   : > { %v304_v14 = vsel %vm302_vm0, %v297_v11, %v299_v13  ;;  %v305_v19 = vsel %vm302_vm0, %v299_v13, %v301_v12  ;;  %v3026_v11 = vld [vmem:[%s4424_s1 + $0xa0] sm:$0xff]  ;;  %v3027_v12 = vld [vmem:[%s4424_s1 + $0xa8] sm:$0xff] }
  0x94   : > { %2959 = vmatprep.subr.msk.mxu0 %vm319_vm1, %v304_v14  ;;  %3259 = vmatprep.subr.msk.mxu1 %vm319_vm1, %v304_v14  ;;  %v709_v18 = vpop.permute.xlu1 %708  ;;  %v3028_v14 = vld [vmem:[%s4424_s1 + $0xb0] sm:$0xff] }
  0x95   : > { %2960 = vmatpush1.msk.msra.mxu0 %vm319_vm1, %v303_v17  ;;  %3260 = vmatpush1.msk.msra.mxu1 %vm319_vm1, %v303_v17 }
  0x96   : > { %2961 = vmatmul.mubr.msk.f32.vlgmr.msra.gmra.mxu0 %vm306_vm2, %v2955_v15  ;;  %2964 = vmatmul.mubr.msk.f32.vlgmr.msra.gmra.mxu1 %vm306_vm2, %v2958_v16  ;;  %v707_v21 = vpop.permute.xlu0 %706 }
  0x97   : > { %3159 = vmatprep.subr.msk.mxu1 %vm319_vm1, %v305_v19  ;;  %396 = vmatprep.mubr.f32.mxu0 %v3460_v0  ;;  %v714_v25 = vsel %vm712_vm3, %v707_v21, %v709_v18 }
  0x98   : > { %3160 = vmatpush3.msk.msra.mxu1 %vm319_vm1, %v305_v19  ;;  %3161 = vmatprep.mubr.msk.f32.mxu1 %vm306_vm2, %v2955_v15  ;;  %v711_v24 = vpop.permute.xlu1 %710  ;;  %v3029_v19 = vld [vmem:[%s4424_s1 + $0xb8] sm:$0xff] }
  0x99   : > { %3167 = vmatprep.subr.msk.mxu0 %vm319_vm1, %v279_v20  ;;  %2970 = vmatprep.subr.msk.mxu1 %vm319_vm1, %v3577_v3  ;;  %v715_v26 = vsel %vm712_vm3, %v709_v18, %v711_v24  ;;  %v3042_v24 = vld [vmem:[%s4424_s1 + $0xc8] sm:$0xff] }
  0x9a   : > { %2962 = vmatmul.mubr.msk.f32.gmra.mxu0 %vm306_vm2, %v2956_v22  ;;  %3162 = vmatmul.mubr.msk.f32.vlgmr.msra.gmra.mxu1 %vm306_vm2, %v2956_v22  ;;  %v705_v27 = vpop.permute.xlu0 %704 }
  0x9b   : > { %402 = vmatprep.mubr.f32.mxu0 %v3460_v0  ;;  %3164 = vmatprep.mubr.msk.f32.mxu1 %vm306_vm2, %v2957_v23  ;;  %v713_v33 = vsel %vm712_vm3, %v705_v27, %v707_v21 }
  0x9c   : > { %3168 = vmatpush3.msk.msra.mxu0 %vm319_vm1, %v279_v20  ;;  %2971 = vmatpush1.msk.msra.mxu1 %vm319_vm1, %v3571_v1  ;;  %v938_v29 = vpop.permute.xlu1 %937  ;;  %v3041_v20 = vld [vmem:[%s4424_s1 + $0xc0] sm:$0xff] }
  0x9d   : > { %2985 = vmatprep.subr.msk.mxu0 %vm319_vm1, %v714_v25  ;;  %3175 = vmatprep.subr.msk.mxu1 %vm319_vm1, %v715_v26  ;;  %v3043_v25 = vld [vmem:[%s4424_s1 + $0xd0] sm:$0xff] }
  0x9e   : > { %2963 = vmatmul.mubr.msk.f32.gmra.mxu0 %vm306_vm2, %v2957_v23  ;;  %3165 = vmatmul.mubr.msk.f32.gmra.mxu1 %vm306_vm2, %v2958_v16  ;;  %v936_v30 = vpop.permute.xlu0 %935 }
  0x9f   : > { %583 = vmatprep.mubr.f32.mxu1 %v3460_v0  ;;  %3169 = vmatprep.mubr.msk.f32.mxu0 %vm306_vm2, %v280_v28  ;;  %v942_v35 = vsel %vm939_vm4, %v936_v30, %v938_v29  ;;  %v3044_v29 = vld [vmem:[%s4424_s1 + $0xd8] sm:$0xff] }
  0xa0   : > { %v932_v34 = vpop.permute.xlu1 %931 }
  0xa2   : > { %2972 = vmatmul.mubr.msk.f32.vlgmr.msra.gmra.mxu1 %vm306_vm2, %v280_v28  ;;  %3170 = vmatmul.mubr.msk.f32.vlgmr.msra.gmra.mxu0 %vm306_vm2, %v281_v31  ;;  %v934_v36 = vpop.permute.xlu0 %933 }
  0xa3   : > { %589 = vmatprep.mubr.f32.mxu1 %v3460_v0  ;;  %3172 = vmatprep.mubr.msk.f32.mxu0 %vm306_vm2, %v282_v32  ;;  %v941_v38 = vsel %vm939_vm4, %v934_v36, %v936_v30  ;;  %v940_v47 = vsel %vm939_vm4, %v932_v34, %v934_v36  ;;  %v3056_v30 = vld [vmem:[%s4424_s1 + $0xe0] sm:$0xff] }
  0xa4   : > { %2986 = vmatpush1.msk.msra.mxu0 %vm319_vm1, %v713_v33  ;;  %3176 = vmatpush3.msk.msra.mxu1 %vm319_vm1, %v715_v26  ;;  %v1163_v40 = vpop.permute.xlu1 %1162  ;;  %v3058_v33 = vld [vmem:[%s4424_s1 + $0xf0] sm:$0xff]  ;;  %v3071_v36 = vld [vmem:[%s4424_s1 + $0x100] sm:$0xff] }
  0xa5   : > { %3183 = vmatprep.subr.msk.mxu0 %vm319_vm1, %v942_v35  ;;  %3000 = vmatprep.subr.msk.mxu1 %vm319_vm1, %v941_v38  ;;  %v3073_v38 = vld [vmem:[%s4424_s1 + $0x110] sm:$0xff] }
  0xa6   : > { %2973 = vmatmul.mubr.msk.f32.gmra.mxu1 %vm306_vm2, %v281_v31  ;;  %3173 = vmatmul.mubr.msk.f32.gmra.mxu0 %vm306_vm2, %v283_v37  ;;  %v1161_v41 = vpop.permute.xlu0 %1160 }
  0xa7   : > { %595 = vmatprep.mubr.f32.mxu1 %v3460_v0  ;;  %798 = vmatprep.mubr.f32.mxu0 %v3460_v0  ;;  %v1168_v42 = vsel %vm1166_vm5, %v1161_v41, %v1163_v40 }
  0xa8   : > { %v1165_v46 = vpop.permute.xlu1 %1164 }
  0xa9   : > { %v1169_v49 = vsel %vm1166_vm5, %v1163_v40, %v1165_v46 }
  0xaa   : > { %2974 = vmatmul.mubr.msk.f32.gmra.mxu1 %vm306_vm2, %v282_v32  ;;  %2987 = vmatmul.mubr.msk.f32.vlgmr.msra.gmra.mxu0 %vm306_vm2, %v2981_v39  ;;  %v1159_v44 = vpop.permute.xlu0 %1158  ;;  %v3057_v32 = vld [vmem:[%s4424_s1 + $0xe8] sm:$0xff] }
  0xab   : > { %601 = vmatprep.mubr.f32.mxu1 %v3460_v0  ;;  %804 = vmatprep.mubr.f32.mxu0 %v3460_v0  ;;  %v1167_v56 = vsel %vm1166_vm5, %v1159_v44, %v1161_v41 }
  0xac   : > { %3184 = vmatpush3.msk.msra.mxu0 %vm319_vm1, %v942_v35  ;;  %v1392_v51 = vpop.permute.xlu1 %1391  ;;  %v3059_v35 = vld [vmem:[%s4424_s1 + $0xf8] sm:$0xff] }
  0xad   : > { %3015 = vmatprep.subr.msk.mxu0 %vm319_vm1, %v1168_v42 }
  0xae   : > { %2975 = vmatmul.mubr.msk.f32.gmra.mxu1 %vm306_vm2, %v283_v37  ;;  %2988 = vmatmul.mubr.msk.f32.gmra.mxu0 %vm306_vm2, %v2982_v43  ;;  %v1390_v48 = vpop.permute.xlu0 %1389  ;;  %v3072_v37 = vld [vmem:[%s4424_s1 + $0x108] sm:$0xff] }
  0xaf   : > { %810 = vmatprep.mubr.f32.mxu0 %v3460_v0  ;;  %3177 = vmatprep.mubr.msk.f32.mxu1 %vm306_vm2, %v2981_v39  ;;  %v1396_v58 = vsel %vm1393_vm6, %v1390_v48, %v1392_v51  ;;  %v3074_v39 = vld [vmem:[%s4424_s1 + $0x118] sm:$0xff] }
  0xb0   : > { %v1386_v57 = vpop.permute.xlu1 %1385 }
  0xb2   : > { %2989 = vmatmul.mubr.msk.f32.gmra.mxu0 %vm306_vm2, %v2983_v45  ;;  %3178 = vmatmul.mubr.msk.f32.vlgmr.msra.gmra.mxu1 %vm306_vm2, %v2982_v43  ;;  %v1388_v54 = vpop.permute.xlu0 %1387 }
  0xb3   : > { %816 = vmatprep.mubr.f32.mxu0 %v3460_v0  ;;  %3180 = vmatprep.mubr.msk.f32.mxu1 %vm306_vm2, %v2983_v45  ;;  %v1395_v59 = vsel %vm1393_vm6, %v1388_v54, %v1390_v48  ;;  %v1394_v6 = vsel %vm1393_vm6, %v1386_v57, %v1388_v54 }
  0xb4   : > { %3001 = vmatpush1.msk.msra.mxu1 %vm319_vm1, %v940_v47  ;;  %v1617_v62 = vpop.permute.xlu1 %1616 }
  0xb5   : > { %3191 = vmatprep.subr.msk.mxu1 %vm319_vm1, %v1169_v49 }
  0xb6   : > { %2990 = vmatmul.mubr.msk.f32.gmra.mxu0 %vm306_vm2, %v2984_v50  ;;  %3181 = vmatmul.mubr.msk.f32.gmra.mxu1 %vm306_vm2, %v2984_v50  ;;  %v1615_v63 = vpop.permute.xlu0 %1614 }
  0xb7   : > { %1025 = vmatprep.mubr.f32.mxu1 %v3460_v0  ;;  %3185 = vmatprep.mubr.msk.f32.mxu0 %vm306_vm2, %v2996_v52  ;;  %v1622_v1 = vsel %vm1620_vm7, %v1615_v63, %v1617_v62 }
  0xb8   : > { %v1619_v5 = vpop.permute.xlu1 %1618 }
  0xb9   : > { %v1623_v8 = vsel %vm1620_vm7, %v1617_v62, %v1619_v5 }
  0xba   : > { %3002 = vmatmul.mubr.msk.f32.vlgmr.msra.gmra.mxu1 %vm306_vm2, %v2996_v52  ;;  %3186 = vmatmul.mubr.msk.f32.vlgmr.msra.gmra.mxu0 %vm306_vm2, %v2997_v53  ;;  %v1613_v3 = vpop.permute.xlu0 %1612 }
  0xbb   : > { %1031 = vmatprep.mubr.f32.mxu1 %v3460_v0  ;;  %3188 = vmatprep.mubr.msk.f32.mxu0 %vm306_vm2, %v2998_v55  ;;  %v1621_v15 = vsel %vm1620_vm7, %v1613_v3, %v1615_v63 }
  0xbc   : > { %3016 = vmatpush1.msk.msra.mxu0 %vm319_vm1, %v1167_v56  ;;  %3192 = vmatpush3.msk.msra.mxu1 %vm319_vm1, %v1169_v49  ;;  %v1846_v10 = vpop.permute.xlu1 %1845 }
  0xbd   : > { %3199 = vmatprep.subr.msk.mxu0 %vm319_vm1, %v1396_v58  ;;  %3030 = vmatprep.subr.msk.mxu1 %vm319_vm1, %v1395_v59 }
  0xbe   : > { %3003 = vmatmul.mubr.msk.f32.gmra.mxu1 %vm306_vm2, %v2997_v53  ;;  %3189 = vmatmul.mubr.msk.f32.gmra.mxu0 %vm306_vm2, %v2999_v60  ;;  %v1844_v7 = vpop.permute.xlu0 %1843 }
  0xbf   : > { %1037 = vmatprep.mubr.f32.mxu1 %v3460_v0  ;;  %1252 = vmatprep.mubr.f32.mxu0 %v3460_v0  ;;  %v1850_v17 = vsel %vm1847_vm8, %v1844_v7, %v1846_v10 }
  0xc0   : > { %v1840_v16 = vpop.permute.xlu1 %1839 }
  0xc2   : > { %3004 = vmatmul.mubr.msk.f32.gmra.mxu1 %vm306_vm2, %v2998_v55  ;;  %3017 = vmatmul.mubr.msk.f32.vlgmr.msra.gmra.mxu0 %vm306_vm2, %v3011_v61  ;;  %v1842_v13 = vpop.permute.xlu0 %1841 }
  0xc3   : > { %1043 = vmatprep.mubr.f32.mxu1 %v3460_v0  ;;  %1258 = vmatprep.mubr.f32.mxu0 %v3460_v0  ;;  %v1849_v18 = vsel %vm1847_vm8, %v1842_v13, %v1844_v7  ;;  %v1848_v27 = vsel %vm1847_vm8, %v1840_v16, %v1842_v13 }
  0xc4   : > { %3200 = vmatpush3.msk.msra.mxu0 %vm319_vm1, %v1396_v58  ;;  %v2071_v21 = vpop.permute.xlu1 %2070 }
  0xc5   : > { %3045 = vmatprep.subr.msk.mxu0 %vm319_vm1, %v1622_v1 }
  0xc6   : > { %3005 = vmatmul.mubr.msk.f32.gmra.mxu1 %vm306_vm2, %v2999_v60  ;;  %3018 = vmatmul.mubr.msk.f32.gmra.mxu0 %vm306_vm2, %v3012_v2  ;;  %v2069_v22 = vpop.permute.xlu0 %2068 }
  0xc7   : > { %1264 = vmatprep.mubr.f32.mxu0 %v3460_v0  ;;  %3193 = vmatprep.mubr.msk.f32.mxu1 %vm306_vm2, %v3011_v61  ;;  %v2076_v23 = vsel %vm2074_vm9, %v2069_v22, %v2071_v21 }
  0xc8   : > { %v2073_v26 = vpop.permute.xlu1 %2072 }
  0xc9   : > { %v2077_v28 = vsel %vm2074_vm9, %v2071_v21, %v2073_v26 }
  0xca   : > { %3019 = vmatmul.mubr.msk.f32.gmra.mxu0 %vm306_vm2, %v3013_v4  ;;  %3194 = vmatmul.mubr.msk.f32.vlgmr.msra.gmra.mxu1 %vm306_vm2, %v3012_v2  ;;  %v2067_v31 = vpop.permute.xlu0 %2066 }
  0xcb   : > { %1270 = vmatprep.mubr.f32.mxu0 %v3460_v0  ;;  %3196 = vmatprep.mubr.msk.f32.mxu1 %vm306_vm2, %v3013_v4  ;;  %v2075_v34 = vsel %vm2074_vm9, %v2067_v31, %v2069_v22 }
  0xcc   : > { %3031 = vmatpush1.msk.msra.mxu1 %vm319_vm1, %v1394_v6 }
  0xcd   : > { %3207 = vmatprep.subr.msk.mxu1 %vm319_vm1, %v1623_v8 }
  0xce   : > { %3020 = vmatmul.mubr.msk.f32.gmra.mxu0 %vm306_vm2, %v3014_v9  ;;  %3197 = vmatmul.mubr.msk.f32.gmra.mxu1 %vm306_vm2, %v3014_v9 }
  0xcf   : > { %1479 = vmatprep.mubr.f32.mxu1 %v3460_v0  ;;  %3201 = vmatprep.mubr.msk.f32.mxu0 %vm306_vm2, %v3026_v11 }
  0xd2   : > { %3032 = vmatmul.mubr.msk.f32.vlgmr.msra.gmra.mxu1 %vm306_vm2, %v3026_v11  ;;  %3202 = vmatmul.mubr.msk.f32.vlgmr.msra.gmra.mxu0 %vm306_vm2, %v3027_v12 }
  0xd3   : > { %1485 = vmatprep.mubr.f32.mxu1 %v3460_v0  ;;  %3204 = vmatprep.mubr.msk.f32.mxu0 %vm306_vm2, %v3028_v14 }
  0xd4   : > { %3046 = vmatpush1.msk.msra.mxu0 %vm319_vm1, %v1621_v15  ;;  %3208 = vmatpush3.msk.msra.mxu1 %vm319_vm1, %v1623_v8 }
  0xd5   : > { %3215 = vmatprep.subr.msk.mxu0 %vm319_vm1, %v1850_v17  ;;  %3060 = vmatprep.subr.msk.mxu1 %vm319_vm1, %v1849_v18 }
  0xd6   : > { %3033 = vmatmul.mubr.msk.f32.gmra.mxu1 %vm306_vm2, %v3027_v12  ;;  %3205 = vmatmul.mubr.msk.f32.gmra.mxu0 %vm306_vm2, %v3029_v19 }
  0xd7   : > { %1491 = vmatprep.mubr.f32.mxu1 %v3460_v0  ;;  %1706 = vmatprep.mubr.f32.mxu0 %v3460_v0 }
  0xda   : > { %3034 = vmatmul.mubr.msk.f32.gmra.mxu1 %vm306_vm2, %v3028_v14  ;;  %3047 = vmatmul.mubr.msk.f32.vlgmr.msra.gmra.mxu0 %vm306_vm2, %v3041_v20 }
  0xdb   : > { %1497 = vmatprep.mubr.f32.mxu1 %v3460_v0  ;;  %1712 = vmatprep.mubr.f32.mxu0 %v3460_v0 }
  0xdc   : > { %3216 = vmatpush3.msk.msra.mxu0 %vm319_vm1, %v1850_v17 }
  0xdd   : > { %3075 = vmatprep.subr.msk.mxu0 %vm319_vm1, %v2076_v23 }
  0xde   : > { %3035 = vmatmul.mubr.msk.f32.gmra.mxu1 %vm306_vm2, %v3029_v19  ;;  %3048 = vmatmul.mubr.msk.f32.gmra.mxu0 %vm306_vm2, %v3042_v24 }
  0xdf   : > { %1718 = vmatprep.mubr.f32.mxu0 %v3460_v0  ;;  %3209 = vmatprep.mubr.msk.f32.mxu1 %vm306_vm2, %v3041_v20 }
  0xe2   : > { %3049 = vmatmul.mubr.msk.f32.gmra.mxu0 %vm306_vm2, %v3043_v25  ;;  %3210 = vmatmul.mubr.msk.f32.vlgmr.msra.gmra.mxu1 %vm306_vm2, %v3042_v24 }
  0xe3   : > { %1724 = vmatprep.mubr.f32.mxu0 %v3460_v0  ;;  %3212 = vmatprep.mubr.msk.f32.mxu1 %vm306_vm2, %v3043_v25 }
  0xe4   : > { %3061 = vmatpush1.msk.msra.mxu1 %vm319_vm1, %v1848_v27 }
  0xe5   : > { %3223 = vmatprep.subr.msk.mxu1 %vm319_vm1, %v2077_v28 }
  0xe6   : > { %3050 = vmatmul.mubr.msk.f32.gmra.mxu0 %vm306_vm2, %v3044_v29  ;;  %3213 = vmatmul.mubr.msk.f32.gmra.mxu1 %vm306_vm2, %v3044_v29 }
  0xe7   : > { %1933 = vmatprep.mubr.f32.mxu1 %v3460_v0  ;;  %3217 = vmatprep.mubr.msk.f32.mxu0 %vm306_vm2, %v3056_v30 }
  0xea   : > { %3062 = vmatmul.mubr.msk.f32.vlgmr.msra.gmra.mxu1 %vm306_vm2, %v3056_v30  ;;  %3218 = vmatmul.mubr.msk.f32.vlgmr.msra.gmra.mxu0 %vm306_vm2, %v3057_v32 }
  0xeb   : > { %1939 = vmatprep.mubr.f32.mxu1 %v3460_v0  ;;  %3220 = vmatprep.mubr.msk.f32.mxu0 %vm306_vm2, %v3058_v33 }
  0xec   : > { %3076 = vmatpush1.msk.msra.mxu0 %vm319_vm1, %v2075_v34  ;;  %3224 = vmatpush3.msk.msra.mxu1 %vm319_vm1, %v2077_v28 }
  0xee   : > { %3063 = vmatmul.mubr.msk.f32.gmra.mxu1 %vm306_vm2, %v3057_v32  ;;  %3221 = vmatmul.mubr.msk.f32.gmra.mxu0 %vm306_vm2, %v3059_v35 }
  0xef   : > { %1945 = vmatprep.mubr.f32.mxu1 %v3460_v0  ;;  %2160 = vmatprep.mubr.f32.mxu0 %v3460_v0 }
  0xf2   : > { %3064 = vmatmul.mubr.msk.f32.gmra.mxu1 %vm306_vm2, %v3058_v33  ;;  %3077 = vmatmul.mubr.msk.f32.vlgmr.msra.gmra.mxu0 %vm306_vm2, %v3071_v36 }
  0xf3   : > { %1951 = vmatprep.mubr.f32.mxu1 %v3460_v0  ;;  %2166 = vmatprep.mubr.f32.mxu0 %v3460_v0 }
  0xf6   : > { %3065 = vmatmul.mubr.msk.f32.gmra.mxu1 %vm306_vm2, %v3059_v35  ;;  %3078 = vmatmul.mubr.msk.f32.gmra.mxu0 %vm306_vm2, %v3072_v37 }
  0xf7   : > { %2172 = vmatprep.mubr.f32.mxu0 %v3460_v0  ;;  %3225 = vmatprep.mubr.msk.f32.mxu1 %vm306_vm2, %v3071_v36 }
  0xfa   : > { %3079 = vmatmul.mubr.msk.f32.gmra.mxu0 %vm306_vm2, %v3073_v38  ;;  %3226 = vmatmul.mubr.msk.f32.vlgmr.msra.gmra.mxu1 %vm306_vm2, %v3072_v37 }
  0xfb   : > { %2178 = vmatprep.mubr.f32.mxu0 %v3460_v0  ;;  %3228 = vmatprep.mubr.msk.f32.mxu1 %vm306_vm2, %v3073_v38 }
  0xfe   : > { %3080 = vmatmul.mubr.msk.f32.gmra.mxu0 %vm306_vm2, %v3074_v39  ;;  %3229 = vmatmul.mubr.msk.f32.gmra.mxu1 %vm306_vm2, %v3074_v39 }
 0x156   : > { %v392_v40 = vpop.f32.mrf.mxu0  ;;  %v410_v41 = vpop.f32.mrf.mxu1 }
 0x158   : > { %v394_v42 = vpop.f32.mrf.mxu0  ;;  %v412_v43 = vpop.f32.mrf.mxu1 }
 0x15a   : > { %v398_v44 = vpop.f32.mrf.mxu0  ;;  %v3163_v45 = vpop.f32.mrf.mxu1 }
 0x15c   : > { %v400_v46 = vpop.f32.mrf.mxu0  ;;  %v481_v47 = vpop.f32.mrf.mxu1 }
 0x15e   : > { %v404_v48 = vpop.f32.mrf.mxu0  ;;  %v3166_v0 = vpop.f32.mrf.mxu1 }
 0x160   : > { %v406_v49 = vpop.f32.mrf.mxu0  ;;  %v491_v50 = vpop.f32.mrf.mxu1 }
 0x162   : > { %v585_v51 = vpop.f32.mrf.mxu1  ;;  %v3171_v52 = vpop.f32.mrf.mxu0 }
 0x163   : > { %v586_v53 = vadd.f32 %v585_v51, %v392_v40  ;;  %v680_v54 = vadd.f32 %v3171_v52, %v3163_v45 }
 0x164   : > { %v587_v55 = vpop.f32.mrf.mxu1  ;;  %v674_v56 = vpop.f32.mrf.mxu0 }
 0x165   : > { %v588_v57 = vadd.f32 %v587_v55, %v394_v42  ;;  %v675_v58 = vadd.f32 %v674_v56, %v481_v47 }
 0x166   : > { %v591_v59 = vpop.f32.mrf.mxu1  ;;  %v3174_v60 = vpop.f32.mrf.mxu0 }
 0x167   : > { %v592_v61 = vadd.f32 %v591_v59, %v398_v44  ;;  %v3882_v62 = vadd.f32 %v3174_v60, %v3166_v0 }
 0x168   : > { %v593_v63 = vpop.f32.mrf.mxu1  ;;  %v684_v1 = vpop.f32.mrf.mxu0 }
 0x169   : > { %v594_v2 = vadd.f32 %v593_v63, %v400_v46  ;;  %v3884_v3 = vadd.f32 %v684_v1, %v491_v50 }
 0x16a   : > { %v597_v4 = vpop.f32.mrf.mxu1  ;;  %v800_v5 = vpop.f32.mrf.mxu0 }
 0x16b   : > { %v598_v6 = vadd.f32 %v597_v4, %v404_v48  ;;  %v3886_v7 = vadd.f32 %v800_v5, %v586_v53 }
 0x16c   : > { %v599_v8 = vpop.f32.mrf.mxu1  ;;  %v802_v9 = vpop.f32.mrf.mxu0 }
 0x16d   : > { %v3888_v10 = vadd.f32 %v599_v8, %v406_v49  ;;  %v3890_v11 = vadd.f32 %v802_v9, %v588_v57 }
 0x16e   : > { %v603_v12 = vpop.f32.mrf.mxu1  ;;  %v806_v13 = vpop.f32.mrf.mxu0 }
 0x16f   : > { %v3892_v14 = vadd.f32 %v603_v12, %v410_v41  ;;  %v3894_v15 = vadd.f32 %v806_v13, %v592_v61 }
 0x170   : > { %v605_v16 = vpop.f32.mrf.mxu1  ;;  %v808_v17 = vpop.f32.mrf.mxu0 }
 0x171   : > { %v3896_v18 = vadd.f32 %v605_v16, %v412_v43  ;;  %v3898_v19 = vadd.f32 %v808_v17, %v594_v2 }
 0x172   : > { %v812_v20 = vpop.f32.mrf.mxu0  ;;  %v3179_v21 = vpop.f32.mrf.mxu1 }
 0x173   : > { %v3900_v22 = vadd.f32 %v812_v20, %v598_v6  ;;  %v913_v23 = vadd.f32 %v3179_v21, %v680_v54 }
 0x174   : > { %v3902_v24 = vpop.f32.mrf.mxu0  ;;  %v889_v25 = vpop.f32.mrf.mxu1 }
 0x175   : > { %v910_v26 = vadd.f32 %v889_v25, %v675_v58 }
 0x176   : > { %v3904_v27 = vpop.f32.mrf.mxu0  ;;  %v3906_v28 = vpop.f32.mrf.mxu1 }
 0x178   : > { %v3908_v29 = vpop.f32.mrf.mxu0  ;;  %v3910_v30 = vpop.f32.mrf.mxu1 }
 0x17a   : > { %v3912_v31 = vpop.f32.mrf.mxu1  ;;  %v3187_v32 = vpop.f32.mrf.mxu0 }
 0x17b   : > { %v3914_v33 = vadd.f32 %v3187_v32, %v913_v23  ;;  %v2323_v23 = vlaneseq }
 0x17c   : > { %v3916_v34 = vpop.f32.mrf.mxu1  ;;  %v1116_v35 = vpop.f32.mrf.mxu0 }
 0x17d   : > { %v3918_v36 = vadd.f32 %v1116_v35, %v910_v26 }
 0x17e   : > { %v3920_v37 = vpop.f32.mrf.mxu1  ;;  %v3922_v38 = vpop.f32.mrf.mxu0 }
 0x180   : > { %v3924_v39 = vpop.f32.mrf.mxu1  ;;  %v3926_v40 = vpop.f32.mrf.mxu0 }
 0x182   : > { %v3928_v41 = vpop.f32.mrf.mxu1  ;;  %v3930_v42 = vpop.f32.mrf.mxu0 }
 0x184   : > { %v3932_v43 = vpop.f32.mrf.mxu1  ;;  %v3934_v44 = vpop.f32.mrf.mxu0 }
 0x186   : > { %v3936_v45 = vpop.f32.mrf.mxu1  ;;  %v3938_v46 = vpop.f32.mrf.mxu0 }
 0x188   : > { %v3940_v47 = vpop.f32.mrf.mxu1  ;;  %v3942_v48 = vpop.f32.mrf.mxu0 }
 0x18a   : > { %v3944_v0 = vpop.f32.mrf.mxu0  ;;  %v3946_v49 = vpop.f32.mrf.mxu1 }
 0x18c   : > { %v3948_v50 = vpop.f32.mrf.mxu0  ;;  %v3950_v51 = vpop.f32.mrf.mxu1 }
 0x18e   : > { %v3952_v52 = vpop.f32.mrf.mxu0  ;;  %v3954_v53 = vpop.f32.mrf.mxu1 }
 0x190   : > { %v3956_v54 = vpop.f32.mrf.mxu0  ;;  %v3958_v55 = vpop.f32.mrf.mxu1 }
 0x192   : > { %v3960_v56 = vpop.f32.mrf.mxu1  ;;  %v3962_v57 = vpop.f32.mrf.mxu0 }
 0x194   : > { %v3964_v58 = vpop.f32.mrf.mxu1  ;;  %v3966_v59 = vpop.f32.mrf.mxu0 }
 0x196   : > { %v3968_v60 = vpop.f32.mrf.mxu1  ;;  %v3970_v61 = vpop.f32.mrf.mxu0 }
 0x198   : > { %v3972_v63 = vpop.f32.mrf.mxu1  ;;  %v3974_v1 = vpop.f32.mrf.mxu0 }
 0x19a   : > { %v3976_v2 = vpop.f32.mrf.mxu1  ;;  %v3978_v4 = vpop.f32.mrf.mxu0 }
 0x19c   : > { %v3980_v5 = vpop.f32.mrf.mxu1  ;;  %v3982_v6 = vpop.f32.mrf.mxu0 }
 0x19e   : > { %v3984_v8 = vpop.f32.mrf.mxu1  ;;  %v3986_v9 = vpop.f32.mrf.mxu0 }
 0x19f   : > { %4433 = vst [vmem:[#allocation5_spill] sm:$0xff] %v3986_v9 }
 0x1a0   : > { %v3988_v12 = vpop.f32.mrf.mxu1  ;;  %v3990_v13 = vpop.f32.mrf.mxu0 }
 0x1a1   : > { %4434 = vst [vmem:[#allocation6_spill] sm:$0xff] %v3988_v12  ;;  %v4008_v12 = vshrl.u32 %v2323_v23, 7  ;;  %v915_v23 = vadd.f32 %v3902_v24, %v3888_v10  ;;  %v916_v10 = vadd.f32 %v3910_v30, %v3884_v3  ;;  %v1136_v24 = vadd.f32 %v3916_v34, %v3890_v11 }
 0x1a2   : > { %v3992_v16 = vpop.f32.mrf.mxu0  ;;  %v3994_v17 = vpop.f32.mrf.mxu1  ;;  %v1141_v3 = vadd.f32 %v3928_v41, %v3900_v22  ;;  %v1367_v22 = vadd.f32 %v3946_v49, %v3914_v33 }
 0x1a3   : > { %4435 = vst [vmem:[#allocation7_spill] sm:$0xff] %v3992_v16  ;;  %4436 = vst [vmem:[#allocation8_spill] sm:$0xff] %v3994_v17  ;;  %v2329_v17 = vsub.s32 1, %v4008_v12  ;;  %v1142_v11 = vadd.f32 %v3932_v43, %v915_v23 }
 0x1a4   : > { %v3996_v20 = vpop.f32.mrf.mxu0  ;;  %v3998_v21 = vpop.f32.mrf.mxu1 }
 0x1a5   : > { %4437 = vst [vmem:[#allocation9_spill] sm:$0xff] %v3996_v20  ;;  %4438 = vst [vmem:[#allocation10_spill] sm:$0xff] %v3998_v21 }
 0x1a6   : > { %v4000_v25 = vpop.f32.mrf.mxu0  ;;  %v4002_v26 = vpop.f32.mrf.mxu1 }
 0x1a7   : > { %4439 = vst [vmem:[#allocation11_spill] sm:$0xff] %v4000_v25  ;;  %4440 = vst [vmem:[#allocation12_spill] sm:$0xff] %v4002_v26  ;;  %v4022_v26 = vld [vmem:[%s4429_s6] sm:$0x7]  ;;  %v917_v25 = vadd.f32 %v3904_v27, %v3892_v14  ;;  %v1139_v14 = vadd.f32 %v3924_v39, %v3898_v19  ;;  %v1369_v39 = vadd.f32 %v3948_v50, %v1142_v11 }
 0x1a8   : > { %v4004_v32 = vpop.f32.mrf.mxu0  ;;  %v4006_v35 = vpop.f32.mrf.mxu1  ;;  %v4449_v23 = vld [vmem:[#allocation6_spill] sm:$0xff] }
 0x1a9   : > { %4441 = vst [vmem:[#allocation13_spill] sm:$0xff] %v4004_v32  ;;  %4442 = vst [vmem:[#allocation14_spill] sm:$0xff] %v4006_v35  ;;  %v918_v32 = vadd.f32 %v3908_v29, %v3896_v18  ;;  %v1143_v18 = vadd.f32 %v3926_v40, %v916_v10  ;;  %v1363_v29 = vadd.f32 %v3934_v44, %v1136_v24  ;;  %v2299_v24 = vpop.permute.xlu1 %2298 }
 0x1aa   : > { %v4010_v9 = vpop.f32.mrf.mxu1  ;;  %v4012_v16 = vpop.f32.mrf.mxu0  ;;  %v1364_v40 = vadd.f32 %v3950_v51, %v3918_v36  ;;  %v4450_v10 = vld [vmem:[#allocation8_spill] sm:$0xff] }
 0x1ab   : > { %4443 = vst [vmem:[#allocation15_spill] sm:$0xff] %v4010_v9  ;;  %4444 = vst [vmem:[#allocation16_spill] sm:$0xff] %v4012_v16  ;;  %v919_v9 = vadd.f32 %v3906_v28, %v3882_v62  ;;  %v1135_v62 = vadd.f32 %v3912_v31, %v3886_v7  ;;  %v1138_v28 = vadd.f32 %v3920_v37, %v3894_v15 }
 0x1ac   : > { %v4015_v20 = vpop.f32.mrf.mxu1  ;;  %v4017_v21 = vpop.f32.mrf.mxu0  ;;  %v1144_v15 = vadd.f32 %v3936_v45, %v917_v25  ;;  %v1145_v19 = vadd.f32 %v3940_v47, %v918_v32  ;;  %v1366_v37 = vadd.f32 %v3942_v48, %v1139_v14  ;;  %v1594_v48 = vadd.f32 %v3962_v57, %v1367_v22  ;;  %v4448_v25 = vld [vmem:[#allocation5_spill] sm:$0xff] }
 0x1ad   : > { %4445 = vst [vmem:[#allocation17_spill] sm:$0xff] %v4015_v20  ;;  %4446 = vst [vmem:[#allocation18_spill] sm:$0xff] %v4017_v21  ;;  %v4034_v20 = vrot.slane %v4022_v26, %v2329_v17  ;;  %v1146_v17 = vadd.f32 %v3922_v38, %v919_v9  ;;  %v1362_v7 = vadd.f32 %v3930_v42, %v1135_v62  ;;  %v4451_v62 = vld [vmem:[#allocation9_spill] sm:$0xff] }
 0x1ae   : > { %v4029_v16 = vpop.f32.mrf.mxu1  ;;  %v4031_v35 = vpop.f32.mrf.mxu0  ;;  %v1365_v30 = vadd.f32 %v3938_v46, %v1138_v28  ;;  %v1368_v38 = vadd.f32 %v3944_v0, %v1141_v3  ;;  %v1371_v41 = vadd.f32 %v3952_v52, %v1144_v15  ;;  %v1372_v43 = vadd.f32 %v3956_v54, %v1145_v19  ;;  %v4454_v3 = vld [vmem:[#allocation12_spill] sm:$0xff] }
 0x1af   : > { %v1373_v42 = vadd.f32 %v3954_v53, %v1146_v17  ;;  %v1370_v46 = vadd.f32 %v3958_v55, %v1143_v18  ;;  %v1589_v47 = vadd.f32 %v3960_v56, %v1362_v7  ;;  %v1590_v33 = vadd.f32 %v3964_v58, %v1363_v29  ;;  %v2304_v19 = vpop.permute.xlu0 %2303 }
 0x1b0   : > { %v1943_v27 = vpop.f32.mrf.mxu1  ;;  %v4052_v21 = vpop.f32.mrf.mxu0  ;;  %v1591_v0 = vadd.f32 %v3966_v59, %v1364_v40  ;;  %v1592_v36 = vadd.f32 %v3968_v60, %v1365_v30  ;;  %v1593_v49 = vadd.f32 %v3972_v63, %v1366_v37  ;;  %v1595_v50 = vadd.f32 %v3976_v2, %v1368_v38  ;;  %v4447_v60 = vld [vmem:[#allocation7_spill] sm:$0xff]  ;;  %v4455_v11 = vld [vmem:[#allocation13_spill] sm:$0xff]  ;;  %v4456_v15 = vld [vmem:[#allocation14_spill] sm:$0xff] }
 0x1b1   : > { %v1600_v53 = vadd.f32 %v3970_v61, %v1373_v42  ;;  %v1597_v54 = vadd.f32 %v3974_v1, %v1370_v46  ;;  %v1816_v55 = vadd.f32 %v3978_v4, %v1589_v47  ;;  %v1596_v56 = vadd.f32 %v3980_v5, %v1369_v39  ;;  %v4452_v5 = vld [vmem:[#allocation10_spill] sm:$0xff] }
 0x1b2   : > { %v1947_v31 = vpop.f32.mrf.mxu1  ;;  %v4063_v34 = vpop.f32.mrf.mxu0  ;;  %v1817_v57 = vadd.f32 %v3982_v6, %v1590_v33  ;;  %v1598_v58 = vadd.f32 %v3984_v8, %v1371_v41  ;;  %v1820_v59 = vadd.f32 %v3990_v13, %v1593_v49  ;;  %v1822_v63 = vadd.f32 %v4447_v60, %v1595_v50  ;;  %v4453_v6 = vld [vmem:[#allocation11_spill] sm:$0xff]  ;;  %v4459_v33 = vld [vmem:[#allocation16_spill] sm:$0xff] }
 0x1b3   : > { %v1819_v32 = vadd.f32 %v4448_v25, %v1592_v36  ;;  %v1599_v61 = vadd.f32 %v4449_v23, %v1372_v43  ;;  %v1821_v1 = vadd.f32 %v4450_v10, %v1594_v48  ;;  %v1823_v4 = vadd.f32 %v4451_v62, %v1596_v56  ;;  %v2294_v56 = vpop.permute.xlu1 %2293 }
 0x1b4   : > { %v1949_v44 = vpop.f32.mrf.mxu1  ;;  %v2164_v45 = vpop.f32.mrf.mxu0  ;;  %v1818_v28 = vadd.f32 %v4452_v5, %v1591_v0  ;;  %v1825_v17 = vadd.f32 %v4453_v6, %v1598_v58  ;;  %v2047_v8 = vadd.f32 %v1943_v27, %v1820_v59  ;;  %v2049_v14 = vadd.f32 %v1947_v31, %v1822_v63  ;;  %v4457_v38 = vld [vmem:[#allocation17_spill] sm:$0xff]  ;;  %v4458_v27 = vld [vmem:[#allocation15_spill] sm:$0xff]  ;;  %v4460_v36 = vld [vmem:[#allocation18_spill] sm:$0xff] }
 0x1b5   : > { %v1827_v7 = vadd.f32 %v4454_v3, %v1600_v53  ;;  %v1826_v29 = vadd.f32 %v4455_v11, %v1599_v61  ;;  %v1824_v30 = vadd.f32 %v4456_v15, %v1597_v54  ;;  %v2050_v37 = vadd.f32 %v1949_v44, %v1823_v4 }
 0x1b6   : > { %v1953_v51 = vpop.f32.mrf.mxu1  ;;  %v2168_v52 = vpop.f32.mrf.mxu0  ;;  %v2044_v22 = vadd.f32 %v4457_v38, %v1817_v57  ;;  %v2046_v39 = vadd.f32 %v4029_v16, %v1819_v32  ;;  %v2043_v31 = vadd.f32 %v4458_v27, %v1816_v55  ;;  %v2048_v0 = vadd.f32 %v4459_v33, %v1821_v1  ;;  %v4176_v33 = vld [vmem:[%s4428_s5 + $0x10] sm:$0xff] }
 0x1b7   : > { %v2054_v46 = vadd.f32 %v4031_v35, %v1827_v7  ;;  %v2052_v47 = vadd.f32 %v1953_v51, %v1825_v17  ;;  %v2045_v49 = vadd.f32 %v4460_v36, %v1818_v28  ;;  %v2051_v55 = vadd.f32 %v4052_v21, %v1824_v30 }
 0x1b8   : > { %v1955_v9 = vpop.f32.mrf.mxu1  ;;  %v2170_v2 = vpop.f32.mrf.mxu0  ;;  %v2271_v50 = vadd.f32 %v2164_v45, %v2044_v22  ;;  %v2273_v44 = vadd.f32 %v2168_v52, %v2046_v39  ;;  %v2270_v45 = vadd.f32 %v4063_v34, %v2043_v31  ;;  %v4461_v61 = vsub.s32 0, %v4008_v12 }
 0x1b9   : > { %v2274_v40 = vadd.f32 %v2170_v2, %v2047_v8  ;;  %v2053_v16 = vadd.f32 %v1955_v9, %v1826_v29  ;;  %v2289_v9 = vpop.permute.xlu0 %2288  ;;  %v4462_v5 = vsub.s32 2, %v4008_v12 }
 0x1ba   : > { %v2174_v13 = vpop.f32.mrf.mxu0  ;;  %v3227_v18 = vpop.f32.mrf.mxu1  ;;  %v4116_v23 = vadd.f32 %v2294_v56, %v2273_v44  ;;  %v4121_v21 = vrot.slane %v4022_v26, %v4461_v61  ;;  %v4125_v62 = vadd.f32 %v2289_v9, %v2271_v50 }
 0x1bb   : > { %v2276_v41 = vadd.f32 %v2174_v13, %v2049_v14  ;;  %v4109_v60 = vadd.f32 %v2294_v56, %v2274_v40  ;;  %v2275_v51 = vadd.f32 %v3227_v18, %v2048_v0  ;;  %v4132_v28 = vrot.slane %v4022_v26, %v4462_v5  ;;  %v4185_v0 = vld [vmem:[%s4428_s5 + $0x18] sm:$0xff] }
 0x1bc   : > { %v2176_v42 = vpop.f32.mrf.mxu0  ;;  %v2251_v43 = vpop.f32.mrf.mxu1  ;;  %v4142_v13 = vadd.f32 %v2289_v9, %v2270_v45  ;;  %v2341_v11 = vmul.f32 %v4121_v21, %v4116_v23  ;;  %v2339_v15 = vmul.f32 %v4034_v20, %v4125_v62 }
 0x1bd   : > { %v2277_v48 = vadd.f32 %v2176_v42, %v2050_v37  ;;  %v4111_v35 = vadd.f32 %v2299_v24, %v2276_v41  ;;  %v2272_v52 = vadd.f32 %v2251_v43, %v2045_v49  ;;  %v2342_v6 = vmul.f32 %v4034_v20, %v4109_v60  ;;  %v2318_v43 = vld [vmem:[%s4428_s5] sm:$0xff] }
 0x1be   : > { %v2180_v53 = vpop.f32.mrf.mxu0  ;;  %v3230_v54 = vpop.f32.mrf.mxu1  ;;  %v4138_v8 = vadd.f32 %v2294_v56, %v2275_v51  ;;  %v2338_v22 = vmul.f32 %v4121_v21, %v4142_v13  ;;  %3239 = vmatprep.mubr.msk.f32.mxu1 %vm2366_vm10, %v2318_v43  ;;  %3253 = vmatprep.mubr.msk.f32.mxu0 %vm2366_vm10, %v2318_v43  ;;  %v2660_v43 = vld [vmem:[%s4426_s3 + $0x18] sm:$0xff] }
 0x1bf   : > { %v4106_v57 = vadd.f32 %v2299_v24, %v2277_v48  ;;  %v2279_v58 = vadd.f32 %v2180_v53, %v2052_v47  ;;  %v2281_v59 = vadd.f32 %v3230_v54, %v2054_v46  ;;  %v2344_v17 = vmul.f32 %v4121_v21, %v4111_v35  ;;  %v4171_v48 = vld [vmem:[%s4428_s5 + $0x8] sm:$0xff] }
 0x1c0   : > { %v2182_v63 = vpop.f32.mrf.mxu0  ;;  %v2261_v2 = vpop.f32.mrf.mxu1  ;;  %v4144_v18 = vadd.f32 %v2289_v9, %v2272_v52  ;;  %v2354_v37 = vadd.f32 %v2342_v6, %v2341_v11  ;;  %v2350_v40 = vadd.f32 %v2339_v15, %v2338_v22 }
 0x1c1   : > { %v4114_v25 = vadd.f32 %v2304_v19, %v2279_v58  ;;  %v2280_v32 = vadd.f32 %v2182_v63, %v2053_v16  ;;  %v2345_v10 = vmul.f32 %v4034_v20, %v4106_v57  ;;  %v2278_v1 = vadd.f32 %v2261_v2, %v2051_v55 }
 0x1c2   : > { %v4127_v4 = vadd.f32 %v2304_v19, %v2281_v59  ;;  %v2340_v39 = vmul.f32 %v4132_v28, %v4144_v18 }
 0x1c3   : > { %v2316_v34 = vadd.f32 %v2304_v19, %v2280_v32  ;;  %v4140_v14 = vadd.f32 %v2299_v24, %v2278_v1  ;;  %v2347_v12 = vmul.f32 %v4121_v21, %v4114_v25  ;;  %v2358_v7 = vadd.f32 %v2345_v10, %v2344_v17 }
 0x1c4   : > { %v2349_v24 = vmul.f32 %v4132_v28, %v4127_v4  ;;  %v2343_v19 = vmul.f32 %v4132_v28, %v4138_v8  ;;  %v2351_v42 = vadd.f32 %v2350_v40, %v2340_v39  ;;  %v2657_v40 = vld [vmem:[%s4426_s3] sm:$0xff] }
 0x1c5   : > { %v2348_v26 = vmul.f32 %v4034_v20, %v2316_v34  ;;  %v2346_v3 = vmul.f32 %v4132_v28, %v4140_v14 }
 0x1c6   : > { %v2355_v41 = vadd.f32 %v2354_v37, %v2343_v19 }
 0x1c7   : > { %v2362_v29 = vadd.f32 %v2348_v26, %v2347_v12  ;;  %v2359_v30 = vadd.f32 %v2358_v7, %v2346_v3 }
 0x1c9   : > { %v2363_v38 = vadd.f32 %v2362_v29, %v2349_v24  ;;  %2360 = vadd.xlane.f32.xlu0 %v2359_v30 }
 0x1cb   : > { %2364 = vadd.xlane.f32.xlu1 %v2363_v38 }
 0x1cd   : > { %2356 = vadd.xlane.f32.xlu0 %v2355_v41  ;;  %v2658_v41 = vld [vmem:[%s4426_s3 + $0x8] sm:$0xff] }
 0x1cf   : > { %2352 = vadd.xlane.f32.xlu1 %v2351_v42  ;;  %v2693_v42 = vld [vmem:[%s4427_s4] sm:$0xff] }
 0x252   : > { %v2361_v27 = vpop.xlane.xlu0 %2360 }
 0x254   : > { %v2365_v31 = vpop.xlane.xlu1 %2364 }
 0x255   : > { %3231 = vmatprep.subr.mxu1 %v2365_v31 }
 0x256   : > { %3232 = vmatpush3.msra.mxu1 %v2365_v31  ;;  %v2357_v46 = vpop.xlane.xlu0 %2356 }
 0x257   : > { %3233 = vmatprep.subr.mxu1 %v2361_v27 }
 0x258   : > { %3234 = vmatpush3.msra.mxu1 %v2361_v27  ;;  %v2353_v47 = vpop.xlane.xlu1 %2352  ;;  %v2694_v27 = vld [vmem:[%s4427_s4 + $0x8] sm:$0xff] }
 0x259   : > { %3235 = vmatprep.subr.mxu1 %v2357_v46 }
 0x25a   : > { %3236 = vmatpush3.msra.mxu1 %v2357_v46 }
 0x25b   : > { %3237 = vmatprep.subr.mxu1 %v2353_v47 }
 0x25c   : > { %3238 = vmatpush3.msra.mxu1 %v2353_v47 }
 0x25d   : > { %3240 = vmatmul.mubr.msk.f32.vlgmr.msra.gmra.mxu1 %vm2366_vm10, %v4171_v48 }
 0x25e   : > { %3242 = vmatprep.mubr.msk.f32.mxu1 %vm2366_vm10, %v4176_v33 }
 0x261   : > { %3243 = vmatmul.mubr.msk.f32.gmra.mxu1 %vm2366_vm10, %v4185_v0 }
 0x31d   : > { %v3241_v36 = vpop.f32.mrf.mxu1 }
 0x31f   : > { %v2445_v49 = vpop.f32.mrf.mxu1 }
 0x321   : > { %v3244_v50 = vpop.f32.mrf.mxu1 }
 0x322   : > { %2481 = vperm.xlu0 %3314, %v3244_v50  }
 0x323   : > { %v2455_v44 = vpop.f32.mrf.mxu1 }
 0x324   : > { %2476 = vperm.xlu1 %3315, %v2455_v44  }
 0x326   : > { %2466 = vperm.xlu0 %3314, %v2445_v49  }
 0x328   : > { %2471 = vperm.xlu1 %3315, %v3241_v36  }
 0x39d   : > { %v2482_v53 = vpop.permute.xlu0 %2481 }
 0x39e   : > { %v4190_v54 = vsub.f32 %v4114_v25, %v2482_v53  ;;  %v4192_v56 = vsub.f32 %v2316_v34, %v2482_v53  ;;  %v4195_v16 = vsub.f32 %v4127_v4, %v2482_v53 }
 0x39f   : > { %v2477_v58 = vpop.permute.xlu1 %2476 }
 0x3a0   : > { %v2505_v59 = vmul.f32 %v4190_v54, %v4121_v21  ;;  %v2506_v55 = vmul.f32 %v4192_v56, %v4034_v20  ;;  %v4202_v51 = vsub.f32 %v4111_v35, %v2477_v58  ;;  %v4205_v63 = vsub.f32 %v4106_v57, %v2477_v58 }
 0x3a1   : > { %v4208_v2 = vsub.f32 %v4140_v14, %v2477_v58  ;;  %v2467_v45 = vpop.permute.xlu0 %2466  ;;  %v2507_v52 = vmul.f32 %v4195_v16, %v4132_v28 }
 0x3a2   : > { %v2502_v25 = vmul.f32 %v4202_v51, %v4121_v21  ;;  %v2503_v32 = vmul.f32 %v4205_v63, %v4034_v20  ;;  %v4217_v9 = vsub.f32 %v4142_v13, %v2467_v45  ;;  %v4220_v35 = vsub.f32 %v4125_v62, %v2467_v45 }
 0x3a3   : > { %v4223_v57 = vsub.f32 %v4144_v18, %v2467_v45  ;;  %v2472_v61 = vpop.permute.xlu1 %2471  ;;  %v2517_v10 = vmul.f32 %v2505_v59, %v2505_v59  ;;  %v2518_v1 = vmul.f32 %v2506_v55, %v2506_v55  ;;  %v2519_v4 = vmul.f32 %v2507_v52, %v2507_v52 }
 0x3a4   : > { %v2496_v34 = vmul.f32 %v4217_v9, %v4121_v21  ;;  %v2497_v5 = vmul.f32 %v4220_v35, %v4034_v20  ;;  %v4230_v6 = vsub.f32 %v4116_v23, %v2472_v61  ;;  %v4233_v17 = vsub.f32 %v4109_v60, %v2472_v61 }
 0x3a5   : > { %v4236_v62 = vsub.f32 %v4138_v8, %v2472_v61  ;;  %v2532_v14 = vadd.f32 %v2518_v1, %v2517_v10  ;;  %v2504_v13 = vmul.f32 %v4208_v2, %v4132_v28  ;;  %v2514_v18 = vmul.f32 %v2502_v25, %v2502_v25 }
 0x3a6   : > { %v2499_v12 = vmul.f32 %v4230_v6, %v4121_v21  ;;  %v2500_v26 = vmul.f32 %v4233_v17, %v4034_v20  ;;  %v2515_v3 = vmul.f32 %v2503_v32, %v2503_v32  ;;  %v2498_v23 = vmul.f32 %v4223_v57, %v4132_v28  ;;  %v2696_v32 = vld [vmem:[%s4427_s4 + $0x18] sm:$0xff] }
 0x3a7   : > { %v2533_v60 = vadd.f32 %v2532_v14, %v2519_v4  ;;  %v2508_v7 = vmul.f32 %v2496_v34, %v2496_v34  ;;  %v2509_v11 = vmul.f32 %v2497_v5, %v2497_v5  ;;  %v2516_v8 = vmul.f32 %v2504_v13, %v2504_v13 }
 0x3a8   : > { %v2528_v24 = vadd.f32 %v2515_v3, %v2514_v18  ;;  %v2501_v29 = vmul.f32 %v4236_v62, %v4132_v28  ;;  %v2511_v15 = vmul.f32 %v2499_v12, %v2499_v12  ;;  %v2510_v30 = vmul.f32 %v2498_v23, %v2498_v23  ;;  %v2659_v28 = vld [vmem:[%s4426_s3 + $0x10] sm:$0xff] }
 0x3a9   : > { %2534 = vadd.xlane.f32.xlu1 %v2533_v60  ;;  %v2520_v19 = vadd.f32 %v2509_v11, %v2508_v7  ;;  %v2512_v21 = vmul.f32 %v2500_v26, %v2500_v26 }
 0x3aa   : > { %v2529_v37 = vadd.f32 %v2528_v24, %v2516_v8  ;;  %v2513_v20 = vmul.f32 %v2501_v29, %v2501_v29 }
 0x3ab   : > { %v2521_v38 = vadd.f32 %v2520_v19, %v2510_v30  ;;  %v2524_v22 = vadd.f32 %v2512_v21, %v2511_v15 }
 0x3ac   : > { %2530 = vadd.xlane.f32.xlu0 %v2529_v37 }
 0x3ad   : > { %2522 = vadd.xlane.f32.xlu1 %v2521_v38  ;;  %v2525_v39 = vadd.f32 %v2524_v22, %v2513_v20 }
 0x3b0   : > { %2526 = vadd.xlane.f32.xlu0 %v2525_v39 }
 0x3be   : > { %2663 = vperm.xlu1 %3315, %v2657_v40  }
 0x3c2   : > { %2673 = vperm.xlu1 %3315, %v2659_v28  }
 0x3c6   : > { %2668 = vperm.xlu0 %3314, %v2658_v41   ;;  %2699 = vperm.xlu1 %3315, %v2693_v42  }
 0x3ca   : > { %2678 = vperm.xlu0 %3314, %v2660_v43  }
 0x3ce   : > { %2704 = vperm.xlu0 %3314, %v2694_v27  }
 0x432   : > { %v2535_v31 = vpop.xlane.xlu1 %2534 }
 0x433   : > { %3245 = vmatprep.subr.mxu0 %v2535_v31 }
 0x434   : > { %3246 = vmatpush3.msra.mxu0 %v2535_v31 }
 0x435   : > { %v2531_v46 = vpop.xlane.xlu0 %2530 }
 0x436   : > { %3247 = vmatprep.subr.mxu0 %v2531_v46  ;;  %v2523_v36 = vpop.xlane.xlu1 %2522 }
 0x437   : > { %3248 = vmatpush3.msra.mxu0 %v2531_v46 }
 0x439   : > { %v2527_v47 = vpop.xlane.xlu0 %2526 }
 0x43a   : > { %3249 = vmatprep.subr.mxu0 %v2527_v47  ;;  %v2664_v61 = vpop.permute.xlu1 %2663 }
 0x43b   : > { %3250 = vmatpush3.msra.mxu0 %v2527_v47 }
 0x43c   : > { %3251 = vmatprep.subr.mxu0 %v2523_v36 }
 0x43d   : > { %3252 = vmatpush3.msra.mxu0 %v2523_v36 }
 0x43e   : > { %3254 = vmatmul.mubr.msk.f32.vlgmr.msra.gmra.mxu0 %vm2366_vm10, %v4171_v48  ;;  %v4278_v1 = vpop.permute.xlu1 %2673 }
 0x43f   : > { %3256 = vmatprep.mubr.msk.f32.mxu0 %vm2366_vm10, %v4176_v33 }
 0x441   : > { %v2669_v10 = vpop.permute.xlu0 %2668 }
 0x442   : > { %3257 = vmatmul.mubr.msk.f32.gmra.mxu0 %vm2366_vm10, %v4185_v0  ;;  %v2695_v0 = vld [vmem:[%s4427_s4 + $0x10] sm:$0xff]  ;;  %v2700_v34 = vpop.permute.xlu1 %2699 }
 0x445   : > { %v2679_v4 = vpop.permute.xlu0 %2678 }
 0x449   : > { %v2705_v5 = vpop.permute.xlu0 %2704 }
 0x4fe   : > { %v3255_v49 = vpop.f32.mrf.mxu0 }
 0x4ff   : > { %v2608_v50 = vadd.f32 1e-05, %v3255_v49 }
 0x500   : > { %v2602_v44 = vpop.f32.mrf.mxu0 }
 0x501   : > { %3318 = vrsqrt.f32 %v2608_v50  ;;  %v2603_v53 = vadd.f32 1e-05, %v2602_v44 }
 0x502   : > { %v3258_v58 = vpop.f32.mrf.mxu0 }
 0x503   : > { %3320 = vrsqrt.f32 %v2603_v53  ;;  %v2618_v59 = vadd.f32 1e-05, %v3258_v58 }
 0x504   : > { %v2612_v55 = vpop.f32.mrf.mxu0 }
 0x505   : > { %v2613_v45 = vadd.f32 1e-05, %v2612_v55  ;;  %3322 = vrsqrt.f32 %v2618_v59 }
 0x507   : > { %3324 = vrsqrt.f32 %v2613_v45 }
 0x50e   : > { %v3319_v52 = vpop.eup %3318 }
 0x50f   : > { %2632 = vperm.xlu1 %3315, %v3319_v52  }
 0x510   : > { %v3321_v48 = vpop.eup %3320 }
 0x511   : > { %2627 = vperm.xlu0 %3314, %v3321_v48  }
 0x512   : > { %v3323_v33 = vpop.eup %3322 }
 0x514   : > { %v3325_v25 = vpop.eup %3324 }
 0x515   : > { %2637 = vperm.xlu1 %3315, %v3325_v25   ;;  %2642 = vperm.xlu0 %3314, %v3323_v33  }
 0x519   : > { %2709 = vperm.xlu1 %3315, %v2695_v0   ;;  %2714 = vperm.xlu0 %3314, %v2696_v32  }
 0x58a   : > { %v2633_v14 = vpop.permute.xlu1 %2632 }
 0x58b   : > { %v2648_v13 = vmul.f32 %v2633_v14, %v4230_v6  ;;  %v2649_v18 = vmul.f32 %v2633_v14, %v4233_v17  ;;  %v2650_v12 = vmul.f32 %v2633_v14, %v4236_v62 }
 0x58c   : > { %v2628_v26 = vpop.permute.xlu0 %2627 }
 0x58d   : > { %v2684_v3 = vmul.f32 %v2669_v10, %v2648_v13  ;;  %v2685_v23 = vmul.f32 %v2669_v10, %v2649_v18  ;;  %v2686_v60 = vmul.f32 %v2669_v10, %v2650_v12  ;;  %v2645_v7 = vmul.f32 %v2628_v26, %v4217_v9 }
 0x58e   : > { %v2646_v11 = vmul.f32 %v2628_v26, %v4220_v35  ;;  %v2647_v8 = vmul.f32 %v2628_v26, %v4223_v57 }
 0x58f   : > { %v4286_v24 = vadd.f32 %v2705_v5, %v2684_v3  ;;  %v4288_v29 = vadd.f32 %v2705_v5, %v2685_v23  ;;  %v4290_v15 = vadd.f32 %v2705_v5, %v2686_v60  ;;  %v2681_v6 = vmul.f32 %v2664_v61, %v2645_v7 }
 0x590   : > { %v2682_v17 = vmul.f32 %v2664_v61, %v2646_v11  ;;  %v2683_v30 = vmul.f32 %v2664_v61, %v2647_v8  ;;  %v2643_v19 = vpop.permute.xlu0 %2642  ;;  %v2638_v20 = vpop.permute.xlu1 %2637 }
 0x591   : > { %v2744_v62 = vand.u32 2147483647, %v4286_v24  ;;  %v2745_v21 = vand.u32 2147483647, %v4288_v29  ;;  %v2746_v9 = vand.u32 2147483647, %v4290_v15  ;;  %v4295_v37 = vadd.f32 %v2700_v34, %v2681_v6 }
 0x592   : > { %v4297_v35 = vadd.f32 %v2700_v34, %v2682_v17  ;;  %v4299_v38 = vadd.f32 %v2700_v34, %v2683_v30  ;;  %v2654_v40 = vmul.f32 %v2643_v19, %v4190_v54  ;;  %v2655_v42 = vmul.f32 %v2643_v19, %v4192_v56 }
 0x593   : > { %v2756_v57 = vsub.f32 0.0, %v2744_v62  ;;  %v2757_v22 = vsub.f32 0.0, %v2745_v21  ;;  %v2758_v39 = vsub.f32 0.0, %v2746_v9  ;;  %v2741_v41 = vand.u32 2147483647, %v4295_v37 }
 0x594   : > { %v2656_v43 = vmul.f32 %v2643_v19, %v4195_v16  ;;  %v2742_v46 = vand.u32 2147483647, %v4297_v35  ;;  %v2651_v47 = vmul.f32 %v2638_v20, %v4202_v51  ;;  %v2743_v36 = vand.u32 2147483647, %v4299_v38  ;;  %v2715_v54 = vpop.permute.xlu0 %2714  ;;  %v2710_v25 = vpop.permute.xlu1 %2709 }
 0x595   : > { %v2771_v28 = vmul.f32 1.442695, %v2756_v57  ;;  %v2773_v27 = vmul.f32 1.442695, %v2757_v22  ;;  %v2775_v31 = vmul.f32 1.442695, %v2758_v39  ;;  %v2652_v50 = vmul.f32 %v2638_v20, %v4205_v63 }
 0x596   : > { %v2753_v49 = vsub.f32 0.0, %v2741_v41  ;;  %v2754_v44 = vsub.f32 0.0, %v2742_v46  ;;  %v2653_v53 = vmul.f32 %v2638_v20, %v4208_v2  ;;  %v2690_v56 = vmul.f32 %v2679_v4, %v2654_v40 }
 0x597   : > { %3326 = vpow2.f32 %v2771_v28  ;;  %v2755_v16 = vsub.f32 0.0, %v2743_v36  ;;  %v2691_v59 = vmul.f32 %v2679_v4, %v2655_v42  ;;  %v2692_v45 = vmul.f32 %v2679_v4, %v2656_v43 }
 0x598   : > { %3328 = vpow2.f32 %v2773_v27  ;;  %v2765_v58 = vmul.f32 1.442695, %v2753_v49  ;;  %v2767_v55 = vmul.f32 1.442695, %v2754_v44  ;;  %v4310_v52 = vadd.f32 %v2715_v54, %v2690_v56 }
 0x599   : > { %3330 = vpow2.f32 %v2775_v31  ;;  %v2687_v51 = vmul.f32 %v4278_v1, %v2651_v47  ;;  %v2769_v48 = vmul.f32 1.442695, %v2755_v16  ;;  %v4313_v33 = vadd.f32 %v2715_v54, %v2691_v59 }
 0x59a   : > { %3332 = vpow2.f32 %v2765_v58  ;;  %v2688_v63 = vmul.f32 %v4278_v1, %v2652_v50  ;;  %v4316_v2 = vadd.f32 %v2715_v54, %v2692_v45  ;;  %v2750_v0 = vand.u32 2147483647, %v4310_v52 }
 0x59b   : > { %3334 = vpow2.f32 %v2767_v55  ;;  %v2751_v32 = vand.u32 2147483647, %v4313_v33  ;;  %v2689_v61 = vmul.f32 %v4278_v1, %v2653_v53  ;;  %v4322_v34 = vadd.f32 %v2710_v25, %v2687_v51 }
 0x59c   : > { %3336 = vpow2.f32 %v2769_v48  ;;  %v2752_v10 = vand.u32 2147483647, %v4316_v2  ;;  %v2762_v4 = vsub.f32 0.0, %v2750_v0  ;;  %v4324_v14 = vadd.f32 %v2710_v25, %v2688_v63 }
 0x59d   : > { %v2763_v5 = vsub.f32 0.0, %v2751_v32  ;;  %v4326_v13 = vadd.f32 %v2710_v25, %v2689_v61  ;;  %v2747_v26 = vand.u32 2147483647, %v4322_v34  ;;  %v2732_v53 = vmax.f32 %v4286_v24, 0.0 }
 0x59e   : > { %v2764_v18 = vsub.f32 0.0, %v2752_v10  ;;  %v2783_v12 = vmul.f32 1.442695, %v2762_v4  ;;  %v2748_v23 = vand.u32 2147483647, %v4324_v14  ;;  %v2733_v58 = vmax.f32 %v4288_v29, 0.0 }
 0x59f   : > { %v2785_v3 = vmul.f32 1.442695, %v2763_v5  ;;  %v2749_v1 = vand.u32 2147483647, %v4326_v13  ;;  %v2759_v7 = vsub.f32 0.0, %v2747_v26  ;;  %v2734_v45 = vmax.f32 %v4290_v15, 0.0 }
 0x5a0   : > { %3338 = vpow2.f32 %v2783_v12  ;;  %v2787_v60 = vmul.f32 1.442695, %v2764_v18  ;;  %v2760_v11 = vsub.f32 0.0, %v2748_v23  ;;  %v2729_v10 = vmax.f32 %v4295_v37, 0.0 }
 0x5a1   : > { %3340 = vpow2.f32 %v2785_v3  ;;  %v2777_v6 = vmul.f32 1.442695, %v2759_v7  ;;  %v2761_v21 = vsub.f32 0.0, %v2749_v1  ;;  %v2730_v18 = vmax.f32 %v4297_v35, 0.0 }
 0x5a2   : > { %3342 = vpow2.f32 %v2787_v60  ;;  %v2779_v9 = vmul.f32 1.442695, %v2760_v11  ;;  %v2731_v3 = vmax.f32 %v4299_v38, 0.0 }
 0x5a3   : > { %3344 = vpow2.f32 %v2777_v6  ;;  %v2781_v41 = vmul.f32 1.442695, %v2761_v21 }
 0x5a4   : > { %v3327_v8 = vpop.eup %3326 }
 0x5a5   : > { %v3329_v17 = vpop.eup %3328  ;;  %v2792_v30 = vadd.f32 1.0, %v3327_v8 }
 0x5a6   : > { %v3331_v62 = vpop.eup %3330  ;;  %v2793_v19 = vadd.f32 1.0, %v3329_v17  ;;  %v2738_v17 = vmax.f32 %v4310_v52, 0.0 }
 0x5a7   : > { %v2794_v57 = vadd.f32 1.0, %v3331_v62  ;;  %3346 = vlog2.f32 %v2792_v30  ;;  %v3333_v20 = vpop.eup %3332 }
 0x5a8   : > { %3348 = vlog2.f32 %v2793_v19  ;;  %v3335_v22 = vpop.eup %3334  ;;  %v2789_v39 = vadd.f32 1.0, %v3333_v20  ;;  %v2739_v19 = vmax.f32 %v4313_v33, 0.0 }
 0x5a9   : > { %3350 = vlog2.f32 %v2794_v57  ;;  %v3337_v40 = vpop.eup %3336  ;;  %v2790_v28 = vadd.f32 1.0, %v3335_v22 }
 0x5aa   : > { %3352 = vpow2.f32 %v2779_v9  ;;  %v2791_v42 = vadd.f32 1.0, %v3337_v40  ;;  %v2740_v9 = vmax.f32 %v4316_v2, 0.0 }
 0x5ab   : > { %3354 = vlog2.f32 %v2789_v39 }
 0x5ac   : > { %3356 = vlog2.f32 %v2790_v28  ;;  %v2735_v28 = vmax.f32 %v4322_v34, 0.0 }
 0x5ad   : > { %3358 = vlog2.f32 %v2791_v42  ;;  %v3339_v43 = vpop.eup %3338 }
 0x5ae   : > { %3360 = vpow2.f32 %v2781_v41  ;;  %v3341_v27 = vpop.eup %3340  ;;  %v2798_v31 = vadd.f32 1.0, %v3339_v43 }
 0x5af   : > { %v3343_v46 = vpop.eup %3342  ;;  %v2799_v47 = vadd.f32 1.0, %v3341_v27 }
 0x5b0   : > { %v2800_v36 = vadd.f32 1.0, %v3343_v46  ;;  %3362 = vlog2.f32 %v2798_v31  ;;  %v3345_v49 = vpop.eup %3344 }
 0x5b1   : > { %3364 = vlog2.f32 %v2799_v47  ;;  %v2795_v54 = vadd.f32 1.0, %v3345_v49 }
 0x5b2   : > { %3366 = vlog2.f32 %v2800_v36 }
 0x5b3   : > { %3368 = vlog2.f32 %v2795_v54 }
 0x5b4   : > { %v3347_v50 = vpop.eup %3346 }
 0x5b5   : > { %v3349_v44 = vpop.eup %3348  ;;  %v2808_v56 = vmul.f32 0.6931472, %v3347_v50 }
 0x5b6   : > { %v3351_v16 = vpop.eup %3350  ;;  %v2810_v59 = vmul.f32 0.6931472, %v3349_v44 }
 0x5b7   : > { %v3353_v55 = vpop.eup %3352  ;;  %v2812_v51 = vmul.f32 0.6931472, %v3351_v16  ;;  %v2828_v48 = vadd.f32 %v2808_v56, %v2732_v53 }
 0x5b8   : > { %v3355_v63 = vpop.eup %3354  ;;  %v2829_v25 = vadd.f32 %v2810_v59, %v2733_v58  ;;  %v2796_v0 = vadd.f32 1.0, %v3353_v55  ;;  %v2737_v59 = vmax.f32 %v4326_v13, 0.0 }
 0x5b9   : > { %v3357_v32 = vpop.eup %3356  ;;  %v2830_v61 = vadd.f32 %v2812_v51, %v2734_v45  ;;  %3370 = vtanh.f32 %v2828_v48  ;;  %v2802_v4 = vmul.f32 0.6931472, %v3355_v63 }
 0x5ba   : > { %v3359_v5 = vpop.eup %3358  ;;  %3372 = vtanh.f32 %v2829_v25  ;;  %v2804_v12 = vmul.f32 0.6931472, %v3357_v32 }
 0x5bb   : > { %v3361_v26 = vpop.eup %3360  ;;  %3374 = vtanh.f32 %v2830_v61  ;;  %v2806_v23 = vmul.f32 0.6931472, %v3359_v5  ;;  %v2825_v60 = vadd.f32 %v2802_v4, %v2729_v10 }
 0x5bc   : > { %v2826_v1 = vadd.f32 %v2804_v12, %v2730_v18  ;;  %v2797_v7 = vadd.f32 1.0, %v3361_v26  ;;  %3376 = vlog2.f32 %v2796_v0 }
 0x5bd   : > { %v2827_v11 = vadd.f32 %v2806_v23, %v2731_v3  ;;  %3378 = vtanh.f32 %v2825_v60  ;;  %v3363_v8 = vpop.eup %3362 }
 0x5be   : > { %3380 = vtanh.f32 %v2826_v1  ;;  %v3365_v6 = vpop.eup %3364  ;;  %v2820_v30 = vmul.f32 0.6931472, %v3363_v8 }
 0x5bf   : > { %3382 = vtanh.f32 %v2827_v11  ;;  %v3367_v62 = vpop.eup %3366  ;;  %v2822_v21 = vmul.f32 0.6931472, %v3365_v6 }
 0x5c0   : > { %3384 = vlog2.f32 %v2797_v7  ;;  %v2824_v57 = vmul.f32 0.6931472, %v3367_v62  ;;  %v2834_v20 = vadd.f32 %v2820_v30, %v2738_v17  ;;  %v3369_v22 = vpop.eup %3368 }
 0x5c1   : > { %v2835_v39 = vadd.f32 %v2822_v21, %v2739_v19  ;;  %v2814_v41 = vmul.f32 0.6931472, %v3369_v22 }
 0x5c2   : > { %v2836_v40 = vadd.f32 %v2824_v57, %v2740_v9  ;;  %3386 = vtanh.f32 %v2834_v20 }
 0x5c3   : > { %3388 = vtanh.f32 %v2835_v39  ;;  %v2831_v43 = vadd.f32 %v2814_v41, %v2735_v28 }
 0x5c4   : > { %3390 = vtanh.f32 %v2836_v40 }
 0x5c5   : > { %3392 = vtanh.f32 %v2831_v43 }
 0x5c6   : > { %v3371_v42 = vpop.eup %3370 }
 0x5c7   : > { %v3373_v27 = vpop.eup %3372  ;;  %v2852_v31 = vmul.f32 %v3371_v42, %v4286_v24  ;;  %v2736_v24 = vmax.f32 %v4324_v14, 0.0 }
 0x5c8   : > { %v3375_v46 = vpop.eup %3374  ;;  %v2853_v47 = vmul.f32 %v3373_v27, %v4288_v29 }
 0x5c9   : > { %v3377_v36 = vpop.eup %3376  ;;  %v2854_v49 = vmul.f32 %v3375_v46, %v4290_v15  ;;  %2864 = vst [vmem:[%s4347_s23 + $0x18] sm:$0xff] %v2852_v31 }
 0x5ca   : > { %v3379_v50 = vpop.eup %3378  ;;  %2865 = vst [vmem:[%s4347_s23 + $0x20] sm:$0xff] %v2853_v47  ;;  %v2816_v54 = vmul.f32 0.6931472, %v3377_v36 }
 0x5cb   : > { %v3381_v44 = vpop.eup %3380  ;;  %2866 = vst [vmem:[%s4347_s23 + $0x28] sm:$0xff] %v2854_v49  ;;  %v2849_v29 = vmul.f32 %v3379_v50, %v4295_v37 }
 0x5cc   : > { %v3383_v53 = vpop.eup %3382  ;;  %v2850_v15 = vmul.f32 %v3381_v44, %v4297_v35  ;;  %v2832_v56 = vadd.f32 %v2816_v54, %v2736_v24 }
 0x5cd   : > { %v3385_v16 = vpop.eup %3384  ;;  %v2851_v58 = vmul.f32 %v3383_v53, %v4299_v38  ;;  %2861 = vst [vmem:[%s4347_s23] sm:$0xff] %v2849_v29 }
 0x5ce   : > { %2862 = vst [vmem:[%s4347_s23 + $0x8] sm:$0xff] %v2850_v15  ;;  %v2818_v55 = vmul.f32 0.6931472, %v3385_v16  ;;  %3394 = vtanh.f32 %v2832_v56 }
 0x5cf   : > { %2863 = vst [vmem:[%s4347_s23 + $0x10] sm:$0xff] %v2851_v58  ;;  %v3387_v45 = vpop.eup %3386 }
 0x5d0   : > { %v2833_v37 = vadd.f32 %v2818_v55, %v2737_v59  ;;  %v3389_v35 = vpop.eup %3388  ;;  %v2858_v51 = vmul.f32 %v3387_v45, %v4310_v52 }
 0x5d1   : > { %v3391_v38 = vpop.eup %3390  ;;  %v2859_v48 = vmul.f32 %v3389_v35, %v4313_v33 }
 0x5d2   : > { %3396 = vtanh.f32 %v2833_v37  ;;  %v2860_v63 = vmul.f32 %v3391_v38, %v4316_v2  ;;  %2870 = vst [vmem:[%s4347_s23 + $0x48] sm:$0xff] %v2858_v51  ;;  %v3393_v25 = vpop.eup %3392 }
 0x5d3   : > { %2871 = vst [vmem:[%s4347_s23 + $0x50] sm:$0xff] %v2859_v48  ;;  %v2855_v0 = vmul.f32 %v3393_v25, %v4322_v34 }
 0x5d4   : > { %2872 = vst [vmem:[%s4347_s23 + $0x58] sm:$0xff] %v2860_v63 }
 0x5d5   : > { %2867 = vst [vmem:[%s4347_s23 + $0x30] sm:$0xff] %v2855_v0 }
 0x5db   : > { %v3395_v32 = vpop.eup %3394 }
 0x5dc   : > { %v2856_v52 = vmul.f32 %v3395_v32, %v4324_v14 }
 0x5de   : > { %2868 = vst [vmem:[%s4347_s23 + $0x38] sm:$0xff] %v2856_v52 }
 0x5df   : > { %v3397_v61 = vpop.eup %3396 }
 0x5e0   : > { %v2857_v33 = vmul.f32 %v3397_v61, %v4326_v13 }
 0x5e2   : > { %2869 = vst [vmem:[%s4347_s23 + $0x40] sm:$0xff] %v2857_v33 }
 0x5e3   : > { %3411 = shalt.err (!%p3408_p3)
}
 0x5e4   : > { %s3412_s19 = scalar_lea.hbm %s4375_s14, 1536  ;;  %s3416_s22 = scalar_lea.hbm %s4430_s7, 3072 }
 0x5e5   : > { %p3413_p4 = scmp.ne.s32.totalorder %s4375_s14, %s3412_s19  ;;  %p3417_p9 = scmp.lt.s32.totalorder %s4375_s14, %s4430_s7 }
 0x5e6   : > { %p3418_p10 = scmp.lt.s32.totalorder %s3416_s22, %s3412_s19 }
 0x5e7   : > { %p3414_p7 = pnand %p3413_p4, %p3551_p5 }
 0x5e8   : > { %p3419_p11 = por %p3418_p10, %p3417_p9 }
 0x5e9   : > { %p3415_p8 = pneg %p3414_p7 }
 0x5eb   : > { %p3420_p12 = pnand %p3419_p11, %p3415_p8 }
 0x5ed   : > { %3423 = shalt.err (!%p3420_p12)
}
 0x5ee   : > { %s3471_s9 = smov 384   ;;  %s3472_s13 = smov 24  }
 0x5ef   : > { %3263 = dma.vmem_to_hbm [thread:$0]  (%p3551_p5), %s4377_s8, 1536, %s4375_s14, %s4383_s28, %s3471_s9, %s3471_s9, %s3472_s13  }
 0x5f0 PF: > { %p3269_p13 = scmp.ge.s32.totalorder %s3458_s27, 2  ;;  %s2902_s17 = sand.u32 1, %s3446_s24  }
 0x5f1   : > { %s2903_s15 = scalar_lea.sflag [#allocation3], %s2902_s17 }
 0x5f2   : > { %p3266_p0 = pnand %p3269_p13, %p3555_p6 }
 0x5f4   : > { %p3267_p1 = pneg %p3266_p0 }
 0x5f6   : > { %3441 = dma.done.wait (%p3267_p1), %s2903_s15, 1536  }
 0x5f7   : > { %3443 = vsyncadd (%p3267_p1), %s2903_s15, 4294965760  ;;  %p17_p2 = scmp.ge.s32.totalorder %s3538_s30, 4   ;;  %s4463_s24 = smov %s3450_s25 }
 0x5f8   : > { %s4464_s25 = smov %s3454_s26  ;;  %s4465_s26 = smov %s3549_s10 }
 0x5f9   : > { %s4466_s27 = smov %s3538_s30  ;;  %19 = sbr.rel (!%p17_p2) target bundleno = 3 (0x3), region = 91 }
 0x5fe   :  { %2908 = vsyncpa [#allocation3], 1 }
 0x5ff   :  { %2910 = vsyncpa [#allocation3 + $0x1], 1 }

</bundles_post_ra>
